<compile_context>
chip_gen: v6e
topology: v6e:2x2x1
jax: 0.10.0
libtpu: 0.0.40
codegen_flags: <defaults>
</compile_context>

<pallas_src>
import math

import jax
import jax.numpy as jnp
from jax import lax
from jax.experimental import pallas as pl
from jax.experimental.pallas import tpu as pltpu

_LN_EPS = 1e-6  # Pyraformer uses nn.LayerNorm(..., eps=1e-6)

# bf16 on v6e/v7x for higher MXU throughput (accumulation stays f32 via
# preferred_element_type); f32 default = exact reference semantics / v5e.
_MXU_DTYPE = jnp.float32

# q @ k^T expressed as a contraction over the shared (last) feature dim of both
# operands -> the MXU consumes K un-transposed (no XLU pass, no VMEM copy).
_TRANS_B_DIMS = (((1,), (1,)), ((), ()))


def _mx(x):
    return x.astype(_MXU_DTYPE)


# ----------------------------------------------------------------------------
# In-kernel helpers
# ----------------------------------------------------------------------------
def _erf_f32(x):
    """XLA's ErfImpl32 rational approximation (mul/add/div only; Mosaic-friendly)."""
    alpha = (-2.72614225801306e-10, 2.77068142495902e-08, -2.10102402082508e-06,
             -5.69250639462346e-05, -7.34990630326855e-04, -2.95459980854025e-03,
             -1.60960333262415e-02)
    beta = (-1.45660718464996e-05, -2.13374055278905e-04, -1.68282697438203e-03,
            -7.37332916720468e-03, -1.42647390514189e-02)
    ax = jnp.clip(x, -4.0, 4.0)
    x2 = ax * ax
    p = jnp.float32(alpha[0]) * x2 + jnp.float32(alpha[1])
    for c in alpha[2:]:
        p = p * x2 + jnp.float32(c)
    q = jnp.float32(beta[0]) * x2 + jnp.float32(beta[1])
    for c in beta[2:]:
        q = q * x2 + jnp.float32(c)
    return ax * p / q


def _gelu_exact(x):
    # torch.nn.functional.gelu default (erf-based).
    return 0.5 * x * (1.0 + _erf_f32(x * jnp.float32(1.0 / math.sqrt(2.0))))


def _layer_norm(y, g, b, eps=_LN_EPS):
    mu = jnp.mean(y, axis=-1, keepdims=True)
    var = jnp.mean(jnp.square(y - mu), axis=-1, keepdims=True)
    return (y - mu) * jax.lax.rsqrt(var + eps) * g + b


def _row_tiling(rows):
    """Largest 8-aligned row tile that keeps >=2 grid steps (v7x dual-TC)."""
    if rows % 16 == 0:
        return rows // 2, 2
    return rows, 1


# ----------------------------------------------------------------------------
# Fused Pallas kernels
# ----------------------------------------------------------------------------
def fused_embedding(xcat, w_emb, bias_pe):
    """out[r] = xcat[r] @ w_emb + (PE + time-bias)[r]  on a flat [B*L, .] slab."""
    rows, k_in = xcat.shape
    d_model = w_emb.shape[1]
    row_tile, n_tiles = _row_tiling(rows)

    def kernel(x_ref, w_ref, bp_ref, o_ref):
        o_ref[...] = (jnp.dot(_mx(x_ref[...]), _mx(w_ref[...]),
                              preferred_element_type=jnp.float32)
                      + bp_ref[...])

    return pl.pallas_call(
        kernel,
        out_shape=jax.ShapeDtypeStruct((rows, d_model), jnp.float32),
        grid=(n_tiles,),
        in_specs=[
            pl.BlockSpec((row_tile, k_in), lambda i: (i, 0)),
            pl.BlockSpec((k_in, d_model), lambda i: (0, 0)),
            pl.BlockSpec((row_tile, d_model), lambda i: (i, 0)),
        ],
        out_specs=pl.BlockSpec((row_tile, d_model), lambda i: (i, 0)),
        compiler_params=pltpu.CompilerParams(dimension_semantics=("parallel",)),
        cost_estimate=pl.CostEstimate(
            flops=2 * rows * k_in * d_model + rows * d_model,
            transcendentals=0,
            bytes_accessed=4 * (rows * k_in + k_in * d_model + 2 * rows * d_model)),
    )(xcat, w_emb, bias_pe)


def fused_mha(x_q, x_kv, w_q_scaled, w_kv, w_o, ln_g, ln_b, mask_bias,
              *, n_head, d_k, d_v):
    """Post-LN MultiHeadAttention, fully fused, grid=(B,) parallel:
       LN( x_q + (softmax((x_q Wq/sqrt(dk))(x_kv Wk)^T + bias)(x_kv Wv)) Wo )

    x_q:[B,Lq,D]  x_kv:[B,Lk,D]  w_q_scaled:[D,H*dk] (1/sqrt(dk) pre-folded)
    w_kv:[D,H*(dk+dv)]  w_o:[H*dv,D]  mask_bias: None or f32 [H*Lq,Lk] (0/-1e9,
    pre-tiled over heads to match the head-stacked score layout).
    """
    bsz, lq, d_model = x_q.shape
    lk = x_kv.shape[1]
    hdk, hdv = n_head * d_k, n_head * d_v
    has_mask = mask_bias is not None

    def kernel(*refs):
        if has_mask:
            (xq_ref, xkv_ref, wq_ref, wkv_ref, wo_ref, g_ref, b_ref, m_ref,
             o_ref, s_ref, ctx_ref) = refs
        else:
            (xq_ref, xkv_ref, wq_ref, wkv_ref, wo_ref, g_ref, b_ref,
             o_ref, s_ref, ctx_ref) = refs

        xq = xq_ref[...]                                          # [Lq, D] f32
        xkv = xkv_ref[...]                                        # [Lk, D] f32

        # Full-width projections (one MXU pass each; K|V weights stacked).
        q = jnp.dot(_mx(xq), _mx(wq_ref[...]),
                    preferred_element_type=jnp.float32)           # [Lq, H*dk]
        kv = jnp.dot(_mx(xkv), _mx(wkv_ref[...]),
                     preferred_element_type=jnp.float32)          # [Lk, H*(dk+dv)]
        k = kv[:, :hdk]
        v = kv[:, hdk:]

        # Per-head scores stacked along rows -> [H*Lq, Lk]; q@k^T expressed as a
        # contraction over the shared feature dim (no materialized K transpose).
        for h in range(n_head):
            qh = q[:, h * d_k:(h + 1) * d_k]
            kh = k[:, h * d_k:(h + 1) * d_k]
            s_ref[h * lq:(h + 1) * lq, :] = lax.dot_general(
                _mx(qh), _mx(kh), _TRANS_B_DIMS,
                preferred_element_type=jnp.float32)

        # Mask (single additive bias) + softmax applied ONCE on the stacked slab.
        s = s_ref[...]
        if has_mask:
            s = s + m_ref[...]
        s = s - jnp.max(s, axis=-1, keepdims=True)
        e = jnp.exp(s)
        # EUP approximate reciprocal: ~1e-4 rel. deviation, fine for inference.
        p = e * pl.reciprocal(jnp.sum(e, axis=-1, keepdims=True), approx=True)

        # Per-head context written into one [Lq, H*dv] scratch ...
        for h in range(n_head):
            ctx_ref[:, h * d_v:(h + 1) * d_v] = jnp.dot(
                _mx(p[h * lq:(h + 1) * lq, :]), _mx(v[:, h * d_v:(h + 1) * d_v]),
                preferred_element_type=jnp.float32)

        # ... so the output projection is ONE full-width matmul.
        out = jnp.dot(_mx(ctx_ref[...]), _mx(wo_ref[...]),
                      preferred_element_type=jnp.float32)         # [Lq, D]
        o_ref[...] = _layer_norm(out + xq, g_ref[...], b_ref[...])

    in_specs = [
        pl.BlockSpec((lq, d_model), lambda i: (i, 0)),
        pl.BlockSpec((lk, d_model), lambda i: (i, 0)),
        pl.BlockSpec((d_model, hdk), lambda i: (0, 0)),
        pl.BlockSpec((d_model, hdk + hdv), lambda i: (0, 0)),
        pl.BlockSpec((hdv, d_model), lambda i: (0, 0)),
        pl.BlockSpec((1, d_model), lambda i: (0, 0)),
        pl.BlockSpec((1, d_model), lambda i: (0, 0)),
    ]
    args = [x_q.reshape(bsz * lq, d_model), x_kv.reshape(bsz * lk, d_model),
            w_q_scaled, w_kv, w_o, ln_g, ln_b]
    if has_mask:
        in_specs.append(pl.BlockSpec((n_head * lq, lk), lambda i: (0, 0)))
        args.append(mask_bias)

    flops = 2 * bsz * (lq * d_model * hdk + lk * d_model * (hdk + hdv)
                       + n_head * lq * lk * (d_k + d_v) + lq * hdv * d_model)
    bytes_acc = 4 * (2 * bsz * lq * d_model + bsz * lk * d_model
                     + d_model * (2 * hdk + hdv) + hdv * d_model + 2 * d_model
                     + (n_head * lq * lk if has_mask else 0))

    out = pl.pallas_call(
        kernel,
        out_shape=jax.ShapeDtypeStruct((bsz * lq, d_model), jnp.float32),
        grid=(bsz,),
        in_specs=in_specs,
        out_specs=pl.BlockSpec((lq, d_model), lambda i: (i, 0)),
        scratch_shapes=[pltpu.VMEM((n_head * lq, lk), jnp.float32),
                        pltpu.VMEM((lq, hdv), jnp.float32)],
        compiler_params=pltpu.CompilerParams(dimension_semantics=("parallel",)),
        cost_estimate=pl.CostEstimate(flops=flops,
                                      transcendentals=bsz * n_head * lq * lk,
                                      bytes_accessed=bytes_acc),
    )(*args)
    return out.reshape(bsz, lq, d_model)


def fused_ffn(x, w1, b1, w2, b2, ln_g, ln_b):
    """LN( x + GELU(x W1 + b1) W2 + b2 ) on a flat [B*L, D] slab, row-tiled."""
    bsz, seq, d_model = x.shape
    d_inner = w1.shape[1]
    rows = bsz * seq
    row_tile, n_tiles = _row_tiling(rows)

    def kernel(x_ref, w1_ref, b1_ref, w2_ref, b2_ref, g_ref, b_ref, o_ref):
        xb = x_ref[...]                                           # [rt, D] f32
        h = jnp.dot(_mx(xb), _mx(w1_ref[...]),
                    preferred_element_type=jnp.float32) + b1_ref[...]
        h = _gelu_exact(h)                                        # f32 elementwise
        y = jnp.dot(_mx(h), _mx(w2_ref[...]),
                    preferred_element_type=jnp.float32) + b2_ref[...]
        o_ref[...] = _layer_norm(y + xb, g_ref[...], b_ref[...])

    out = pl.pallas_call(
        kernel,
        out_shape=jax.ShapeDtypeStruct((rows, d_model), jnp.float32),
        grid=(n_tiles,),
        in_specs=[
            pl.BlockSpec((row_tile, d_model), lambda i: (i, 0)),
            pl.BlockSpec((d_model, d_inner), lambda i: (0, 0)),
            pl.BlockSpec((1, d_inner), lambda i: (0, 0)),
            pl.BlockSpec((d_inner, d_model), lambda i: (0, 0)),
            pl.BlockSpec((1, d_model), lambda i: (0, 0)),
            pl.BlockSpec((1, d_model), lambda i: (0, 0)),
            pl.BlockSpec((1, d_model), lambda i: (0, 0)),
        ],
        out_specs=pl.BlockSpec((row_tile, d_model), lambda i: (i, 0)),
        compiler_params=pltpu.CompilerParams(dimension_semantics=("parallel",)),
        cost_estimate=pl.CostEstimate(
            flops=4 * rows * d_model * d_inner,
            transcendentals=rows * d_inner,
            bytes_accessed=4 * (2 * rows * d_model + 2 * d_model * d_inner
                                + d_inner + 3 * d_model)),
    )(x.reshape(rows, d_model), w1, b1, w2, b2, ln_g, ln_b)
    return out.reshape(bsz, seq, d_model)


# ----------------------------------------------------------------------------
# Model pieces (thin glue around the fused kernels)
# ----------------------------------------------------------------------------
def positional_embedding(seq_len, d_model):
    pos = jnp.arange(seq_len, dtype=jnp.float32)[:, None]
    div = jnp.exp(jnp.arange(0, d_model, 2, dtype=jnp.float32)
                  * -(math.log(10000.0) / d_model))
    pe = jnp.zeros((seq_len, d_model), jnp.float32)
    pe = pe.at[:, 0::2].set(jnp.sin(pos * div))
    pe = pe.at[:, 1::2].set(jnp.cos(pos * div))
    return pe


def data_embedding(p, x_dec, x_mark):
    """DataEmbedding = TokenEmbedding(Conv1d k=3 circular, no bias)
                      + PositionalEmbedding + TimeFeatureEmbedding(Linear),
    realized as ONE fused matmul kernel over [unfolded-windows | x_mark]."""
    bsz, seq, c_in = x_dec.shape
    d_model = p["w"].shape[1]
    # circular pad along time (pad=1) then unfold k=3 windows (plain-JAX glue)
    xp = jnp.concatenate([x_dec[:, -1:, :], x_dec, x_dec[:, :1, :]], axis=1)
    windows = jnp.stack([xp[:, 0:seq], xp[:, 1:seq + 1], xp[:, 2:seq + 2]], axis=2)
    xw = windows.reshape(bsz, seq, 3 * c_in)                  # [B, L, 3*C]
    xcat = jnp.concatenate([xw, x_mark], axis=-1)             # [B, L, 3*C + mark]
    xcat = xcat.reshape(bsz * seq, xcat.shape[-1])            # lane/sublane-dense
    pe = positional_embedding(seq, d_model)                   # tiny; const under jit
    bias_pe = jnp.tile(pe + p["b"][None, :], (bsz, 1))        # [B*L, D]
    out = fused_embedding(xcat, p["w"], bias_pe)              # dropout == identity
    return out.reshape(bsz, seq, d_model)


def decoder_layer(p, q, kv, mask_bias, n_head, d_k, d_v):
    x = fused_mha(q, kv, p["w_q"], p["w_kv"], p["w_o"], p["ln1_g"], p["ln1_b"],
                  mask_bias, n_head=n_head, d_k=d_k, d_v=d_v)
    return fused_ffn(x, p["ffn_w1"], p["ffn_b1"], p["ffn_w2"], p["ffn_b2"],
                     p["ln2_g"], p["ln2_b"])


def decoder_forward(params, x_dec, x_mark_dec, refer, mask_bias, n_head, d_k, d_v):
    dec_enc = data_embedding(params["embed"], x_dec, x_mark_dec)
    dec_enc = decoder_layer(params["layer0"], dec_enc, refer, None,
                            n_head, d_k, d_v)
    refer_enc = jnp.concatenate([refer, dec_enc], axis=1)
    # Reference does mask.repeat(B,1,1); the mask is batch/head-invariant, so a
    # single precomputed additive [H*Lq, Lk] bias is broadcast via BlockSpec.
    dec_enc = decoder_layer(params["layer1"], dec_enc, refer_enc, mask_bias,
                            n_head, d_k, d_v)
    return dec_enc


# ----------------------------------------------------------------------------
# Parameters: synthetic torch-layout init + one-time prep (fold/stack)
# ----------------------------------------------------------------------------
def init_params(key, enc_in, mark_dim, d_model, d_inner, n_head, d_k, d_v):
    keys = iter(jax.random.split(key, 32))

    def w(shape, scale=0.1):
        return scale * jax.random.normal(next(keys), shape, jnp.float32)

    embed = dict(
        conv_w=w((3 * enc_in, d_model)),   # conv_w[k*C+c, o] == torch Conv1d w[o, c, k]
        time_w=w((mark_dim, d_model)),     # TimeFeatureEmbedding Linear
        time_b=w((d_model,)),
    )

    def layer():
        return dict(
            w_q=w((d_model, n_head * d_k)),
            w_k=w((d_model, n_head * d_k)),
            w_v=w((d_model, n_head * d_v)),
            w_o=w((n_head * d_v, d_model)),
            ln1_g=jnp.ones((d_model,), jnp.float32),
            ln1_b=jnp.zeros((d_model,), jnp.float32),
            ffn_w1=w((d_model, d_inner)),
            ffn_b1=w((d_inner,)),
            ffn_w2=w((d_inner, d_model)),
            ffn_b2=w((d_model,)),
            ln2_g=jnp.ones((d_model,), jnp.float32),
            ln2_b=jnp.zeros((d_model,), jnp.float32),
        )

    return dict(embed=embed, layer0=layer(), layer1=layer())


def prepare_params(raw, d_k):
    """One-time parameter prep (NOT per forward): fold 1/sqrt(dk) into Wq,
    stack Wk|Wv, stack conv|time embedding weights, make biases/LN params 2-D."""
    def prep_layer(l):
        d_model = l["w_q"].shape[0]
        d_inner = l["ffn_w1"].shape[1]
        return dict(
            w_q=l["w_q"] * jnp.float32(1.0 / math.sqrt(d_k)),
            w_kv=jnp.concatenate([l["w_k"], l["w_v"]], axis=1),
            w_o=l["w_o"],
            ln1_g=l["ln1_g"].reshape(1, d_model),
            ln1_b=l["ln1_b"].reshape(1, d_model),
            ffn_w1=l["ffn_w1"],
            ffn_b1=l["ffn_b1"].reshape(1, d_inner),
            ffn_w2=l["ffn_w2"],
            ffn_b2=l["ffn_b2"].reshape(1, d_model),
            ln2_g=l["ln2_g"].reshape(1, d_model),
            ln2_b=l["ln2_b"].reshape(1, d_model),
        )

    embed = dict(
        w=jnp.concatenate([raw["embed"]["conv_w"], raw["embed"]["time_w"]], axis=0),
        b=raw["embed"]["time_b"],
    )
    return dict(embed=embed,
                layer0=prep_layer(raw["layer0"]),
                layer1=prep_layer(raw["layer1"]))


def prepare_attn_mask(mask_bool, n_head):
    """Boolean mask (True == masked) -> additive f32 bias (0 / -1e9), pre-tiled
    over heads to match the kernel's head-stacked [H*Lq, Lk] score layout."""
    bias = jnp.where(mask_bool, jnp.float32(-1e9), jnp.float32(0.0))
    return jnp.tile(bias, (n_head, 1))


# ----------------------------------------------------------------------------
if __name__ == "__main__":
    B, L_DEC, L_REF = 2, 8, 8
    ENC_IN, MARK_DIM = 4, 4
    D_MODEL, D_INNER, N_HEAD, D_K, D_V = 32, 64, 4, 8, 8

    key = jax.random.PRNGKey(0)
    k_x, k_m, k_r, k_p = jax.random.split(key, 4)
    x_dec = jax.random.normal(k_x, (B, L_DEC, ENC_IN), jnp.float32)
    x_mark_dec = jax.random.normal(k_m, (B, L_DEC, MARK_DIM), jnp.float32)
    refer = jax.random.normal(k_r, (B, L_REF, D_MODEL), jnp.float32)

    # Decoder.__init__ mask: [L_dec, L_ref + L_dec]; True == masked.
    causal = jnp.triu(jnp.ones((L_DEC, L_DEC), dtype=bool), k=1)
    mask = jnp.concatenate([jnp.zeros((L_DEC, L_REF), dtype=bool), causal], axis=1)
    mask_bias = prepare_attn_mask(mask, N_HEAD)

    raw_params = init_params(k_p, ENC_IN, MARK_DIM, D_MODEL, D_INNER,
                             N_HEAD, D_K, D_V)
    params = prepare_params(raw_params, D_K)   # fold/stack once, outside jit

    fwd = jax.jit(lambda p, xd, xm, r, m: decoder_forward(
        p, xd, xm, r, m, N_HEAD, D_K, D_V))
    out = jax.block_until_ready(fwd(params, x_dec, x_mark_dec, refer, mask_bias))

    assert out.shape == (B, L_DEC, D_MODEL) and out.dtype == jnp.float32
    assert bool(jnp.all(jnp.isfinite(out)))
    print("KERNEL_OK")
</pallas_src>

<mosaic_0001>
module attributes {stable_mosaic.version = 11 : i64} {
  func.func @kernel(%arg0: i32, %arg1: memref<8x16xf32, #tpu.memory_space<vmem>>, %arg2: memref<16x32xf32, #tpu.memory_space<vmem>>, %arg3: memref<8x32xf32, #tpu.memory_space<vmem>>, %arg4: memref<8x32xf32, #tpu.memory_space<vmem>>) attributes {dimension_semantics = [#tpu.dimension_semantics<parallel>], iteration_bounds = array<i64: 2>, scalar_prefetch = 0 : i64, scratch_operands = 0 : i64, tpu.core_type = #tpu.core_type<tc>, window_params = [{transform_indices = @transform_0, window_bounds = array<i64: 8, 16>}, {pipeline_mode = #tpu.pipeline_mode<synchronous>, transform_indices = @transform_1, window_bounds = array<i64: 16, 32>}, {transform_indices = @transform_2, window_bounds = array<i64: 8, 32>}, {transform_indices = @transform_3, window_bounds = array<i64: 8, 32>}]} {
    %c0 = arith.constant 0 : index
    %c0_0 = arith.constant 0 : index
    %0 = vector.load %arg1[%c0, %c0_0] : memref<8x16xf32, #tpu.memory_space<vmem>>, vector<8x16xf32>
    %c0_1 = arith.constant 0 : index
    %c0_2 = arith.constant 0 : index
    %1 = vector.load %arg2[%c0_1, %c0_2] : memref<16x32xf32, #tpu.memory_space<vmem>>, vector<16x32xf32>
    %cst = arith.constant dense<0.000000e+00> : vector<8x32xf32>
    %2 = tpu.matmul %0, %1, %cst {dimension_numbers = #tpu.dot_dimension_numbers<[1], [0], [0], [1], [0, 0, 1, 1], [], []>} : vector<8x16xf32>, vector<16x32xf32>, vector<8x32xf32> -> vector<8x32xf32>
    %c0_3 = arith.constant 0 : index
    %c0_4 = arith.constant 0 : index
    %3 = vector.load %arg3[%c0_3, %c0_4] : memref<8x32xf32, #tpu.memory_space<vmem>>, vector<8x32xf32>
    %4 = arith.addf %2, %3 : vector<8x32xf32>
    %c0_5 = arith.constant 0 : index
    %c0_6 = arith.constant 0 : index
    %5 = vector.load %arg4[%c0_5, %c0_6] : memref<8x32xf32, #tpu.memory_space<vmem>>, vector<8x32xf32>
    tpu.vector_store %arg4[%c0_5, %c0_6], %4 {strides = array<i32>} : memref<8x32xf32, #tpu.memory_space<vmem>>, vector<8x32xf32>,
    return
  }
  func.func @transform_0(%arg0: i32) -> (i32, i32) {
    %c0_i32 = arith.constant 0 : i32
    %c0_i32_0 = arith.constant 0 : i32
    return %arg0, %c0_i32 : i32, i32
  }
  func.func @transform_1(%arg0: i32) -> (i32, i32) {
    %c0_i32 = arith.constant 0 : i32
    %c0_i32_0 = arith.constant 0 : i32
    %c0_i32_1 = arith.constant 0 : i32
    return %c0_i32, %c0_i32_0 : i32, i32
  }
  func.func @transform_2(%arg0: i32) -> (i32, i32) {
    %c0_i32 = arith.constant 0 : i32
    %c0_i32_0 = arith.constant 0 : i32
    return %arg0, %c0_i32 : i32, i32
  }
  func.func @transform_3(%arg0: i32) -> (i32, i32) {
    %c0_i32 = arith.constant 0 : i32
    %c0_i32_0 = arith.constant 0 : i32
    return %arg0, %c0_i32 : i32, i32
  }
}

module attributes {stable_mosaic.version = 11 : i64} {
  func.func @kernel(%arg0: i32, %arg1: memref<8x32xf32, #tpu.memory_space<vmem>>, %arg2: memref<8x32xf32, #tpu.memory_space<vmem>>, %arg3: memref<32x32xf32, #tpu.memory_space<vmem>>, %arg4: memref<32x64xf32, #tpu.memory_space<vmem>>, %arg5: memref<32x32xf32, #tpu.memory_space<vmem>>, %arg6: memref<1x32xf32, #tpu.memory_space<vmem>>, %arg7: memref<1x32xf32, #tpu.memory_space<vmem>>, %arg8: memref<8x32xf32, #tpu.memory_space<vmem>>, %arg9: memref<32x8xf32, #tpu.memory_space<vmem>>, %arg10: memref<8x32xf32, #tpu.memory_space<vmem>>) attributes {dimension_semantics = [#tpu.dimension_semantics<parallel>], iteration_bounds = array<i64: 2>, scalar_prefetch = 0 : i64, scratch_operands = 2 : i64, tpu.core_type = #tpu.core_type<tc>, window_params = [{transform_indices = @transform_0, window_bounds = array<i64: 8, 32>}, {transform_indices = @transform_1, window_bounds = array<i64: 8, 32>}, {pipeline_mode = #tpu.pipeline_mode<synchronous>, transform_indices = @transform_2, window_bounds = array<i64: 32, 32>}, {pipeline_mode = #tpu.pipeline_mode<synchronous>, transform_indices = @transform_3, window_bounds = array<i64: 32, 64>}, {pipeline_mode = #tpu.pipeline_mode<synchronous>, transform_indices = @transform_4, window_bounds = array<i64: 32, 32>}, {pipeline_mode = #tpu.pipeline_mode<synchronous>, transform_indices = @transform_5, window_bounds = array<i64: 1, 32>}, {pipeline_mode = #tpu.pipeline_mode<synchronous>, transform_indices = @transform_6, window_bounds = array<i64: 1, 32>}, {transform_indices = @transform_7, window_bounds = array<i64: 8, 32>}]} {
    %c0 = arith.constant 0 : index
    %c0_0 = arith.constant 0 : index
    %0 = vector.load %arg1[%c0, %c0_0] : memref<8x32xf32, #tpu.memory_space<vmem>>, vector<8x32xf32>
    %c0_1 = arith.constant 0 : index
    %c0_2 = arith.constant 0 : index
    %1 = vector.load %arg2[%c0_1, %c0_2] : memref<8x32xf32, #tpu.memory_space<vmem>>, vector<8x32xf32>
    %c0_3 = arith.constant 0 : index
    %c0_4 = arith.constant 0 : index
    %2 = vector.load %arg3[%c0_3, %c0_4] : memref<32x32xf32, #tpu.memory_space<vmem>>, vector<32x32xf32>
    %cst = arith.constant dense<0.000000e+00> : vector<8x32xf32>
    %3 = tpu.matmul %0, %2, %cst {dimension_numbers = #tpu.dot_dimension_numbers<[1], [0], [0], [1], [0, 0, 1, 1], [], []>} : vector<8x32xf32>, vector<32x32xf32>, vector<8x32xf32> -> vector<8x32xf32>
    %c0_5 = arith.constant 0 : index
    %c0_6 = arith.constant 0 : index
    %4 = vector.load %arg4[%c0_5, %c0_6] : memref<32x64xf32, #tpu.memory_space<vmem>>, vector<32x64xf32>
    %cst_7 = arith.constant dense<0.000000e+00> : vector<8x64xf32>
    %5 = tpu.matmul %1, %4, %cst_7 {dimension_numbers = #tpu.dot_dimension_numbers<[1], [0], [0], [1], [0, 0, 1, 1], [], []>} : vector<8x32xf32>, vector<32x64xf32>, vector<8x64xf32> -> vector<8x64xf32>
    %6 = vector.extract_strided_slice %5 {offsets = [0, 0], sizes = [8, 32], strides = [1, 1]} : vector<8x64xf32> to vector<8x32xf32>
    %7 = vector.extract_strided_slice %5 {offsets = [0, 32], sizes = [8, 32], strides = [1, 1]} : vector<8x64xf32> to vector<8x32xf32>
    %8 = vector.extract_strided_slice %3 {offsets = [0, 0], sizes = [8, 8], strides = [1, 1]} : vector<8x32xf32> to vector<8x8xf32>
    %9 = vector.extract_strided_slice %6 {offsets = [0, 0], sizes = [8, 8], strides = [1, 1]} : vector<8x32xf32> to vector<8x8xf32>
    %cst_8 = arith.constant dense<0.000000e+00> : vector<8x8xf32>
    %10 = tpu.matmul %8, %9, %cst_8 {dimension_numbers = #tpu.dot_dimension_numbers<[1], [1], [0], [0], [0, 0, 1, 0], [], []>} : vector<8x8xf32>, vector<8x8xf32>, vector<8x8xf32> -> vector<8x8xf32>
    %c0_9 = arith.constant 0 : index
    %c0_10 = arith.constant 0 : index
    %11 = vector.load %arg9[%c0_9, %c0_10] : memref<32x8xf32, #tpu.memory_space<vmem>>, vector<8x8xf32>
    tpu.vector_store %arg9[%c0_9, %c0_10], %10 {strides = array<i32>} : memref<32x8xf32, #tpu.memory_space<vmem>>, vector<8x8xf32>,
    %12 = vector.extract_strided_slice %3 {offsets = [0, 8], sizes = [8, 8], strides = [1, 1]} : vector<8x32xf32> to vector<8x8xf32>
    %13 = vector.extract_strided_slice %6 {offsets = [0, 8], sizes = [8, 8], strides = [1, 1]} : vector<8x32xf32> to vector<8x8xf32>
    %cst_11 = arith.constant dense<0.000000e+00> : vector<8x8xf32>
    %14 = tpu.matmul %12, %13, %cst_11 {dimension_numbers = #tpu.dot_dimension_numbers<[1], [1], [0], [0], [0, 0, 1, 0], [], []>} : vector<8x8xf32>, vector<8x8xf32>, vector<8x8xf32> -> vector<8x8xf32>
    %c8 = arith.constant 8 : index
    %c0_12 = arith.constant 0 : index
    %15 = vector.load %arg9[%c8, %c0_12] : memref<32x8xf32, #tpu.memory_space<vmem>>, vector<8x8xf32>
    tpu.vector_store %arg9[%c8, %c0_12], %14 {strides = array<i32>} : memref<32x8xf32, #tpu.memory_space<vmem>>, vector<8x8xf32>,
    %16 = vector.extract_strided_slice %3 {offsets = [0, 16], sizes = [8, 8], strides = [1, 1]} : vector<8x32xf32> to vector<8x8xf32>
    %17 = vector.extract_strided_slice %6 {offsets = [0, 16], sizes = [8, 8], strides = [1, 1]} : vector<8x32xf32> to vector<8x8xf32>
    %cst_13 = arith.constant dense<0.000000e+00> : vector<8x8xf32>
    %18 = tpu.matmul %16, %17, %cst_13 {dimension_numbers = #tpu.dot_dimension_numbers<[1], [1], [0], [0], [0, 0, 1, 0], [], []>} : vector<8x8xf32>, vector<8x8xf32>, vector<8x8xf32> -> vector<8x8xf32>
    %c16 = arith.constant 16 : index
    %c0_14 = arith.constant 0 : index
    %19 = vector.load %arg9[%c16, %c0_14] : memref<32x8xf32, #tpu.memory_space<vmem>>, vector<8x8xf32>
    tpu.vector_store %arg9[%c16, %c0_14], %18 {strides = array<i32>} : memref<32x8xf32, #tpu.memory_space<vmem>>, vector<8x8xf32>,
    %20 = vector.extract_strided_slice %3 {offsets = [0, 24], sizes = [8, 8], strides = [1, 1]} : vector<8x32xf32> to vector<8x8xf32>
    %21 = vector.extract_strided_slice %6 {offsets = [0, 24], sizes = [8, 8], strides = [1, 1]} : vector<8x32xf32> to vector<8x8xf32>
    %cst_15 = arith.constant dense<0.000000e+00> : vector<8x8xf32>
    %22 = tpu.matmul %20, %21, %cst_15 {dimension_numbers = #tpu.dot_dimension_numbers<[1], [1], [0], [0], [0, 0, 1, 0], [], []>} : vector<8x8xf32>, vector<8x8xf32>, vector<8x8xf32> -> vector<8x8xf32>
    %c24 = arith.constant 24 : index
    %c0_16 = arith.constant 0 : index
    %23 = vector.load %arg9[%c24, %c0_16] : memref<32x8xf32, #tpu.memory_space<vmem>>, vector<8x8xf32>
    tpu.vector_store %arg9[%c24, %c0_16], %22 {strides = array<i32>} : memref<32x8xf32, #tpu.memory_space<vmem>>, vector<8x8xf32>,
    %c0_17 = arith.constant 0 : index
    %c0_18 = arith.constant 0 : index
    %24 = vector.load %arg9[%c0_17, %c0_18] : memref<32x8xf32, #tpu.memory_space<vmem>>, vector<32x8xf32>
    %cst_19 = arith.constant dense<0xFF800000> : vector<32xf32>
    %25 = vector.multi_reduction <maximumf>, %24, %cst_19 [1] : vector<32x8xf32> to vector<32xf32>
    %26 = vector.shape_cast %25 : vector<32xf32> to vector<32x1xf32>
    %27 = vector.broadcast %26 : vector<32x1xf32> to vector<32x8xf32>
    %28 = arith.subf %24, %27 : vector<32x8xf32>
    %29 = math.exp %28 : vector<32x8xf32>
    %cst_20 = arith.constant dense<0.000000e+00> : vector<32xf32>
    %30 = vector.multi_reduction <add>, %29, %cst_20 [1] : vector<32x8xf32> to vector<32xf32>
    %31 = vector.shape_cast %30 : vector<32xf32> to vector<32x1xf32>
    %32 = tpu.reciprocal %31 {approx = true} : vector<32x1xf32> -> vector<32x1xf32>
    %33 = vector.broadcast %32 : vector<32x1xf32> to vector<32x8xf32>
    %34 = arith.mulf %29, %33 : vector<32x8xf32>
    %35 = vector.extract_strided_slice %34 {offsets = [0, 0], sizes = [8, 8], strides = [1, 1]} : vector<32x8xf32> to vector<8x8xf32>
    %36 = vector.extract_strided_slice %7 {offsets = [0, 0], sizes = [8, 8], strides = [1, 1]} : vector<8x32xf32> to vector<8x8xf32>
    %cst_21 = arith.constant dense<0.000000e+00> : vector<8x8xf32>
    %37 = tpu.matmul %35, %36, %cst_21 {dimension_numbers = #tpu.dot_dimension_numbers<[1], [0], [0], [1], [0, 0, 1, 1], [], []>} : vector<8x8xf32>, vector<8x8xf32>, vector<8x8xf32> -> vector<8x8xf32>
    %c0_22 = arith.constant 0 : index
    %c0_23 = arith.constant 0 : index
    %38 = vector.load %arg10[%c0_22, %c0_23] : memref<8x32xf32, #tpu.memory_space<vmem>>, vector<8x8xf32>
    tpu.vector_store %arg10[%c0_22, %c0_23], %37 {strides = array<i32>} : memref<8x32xf32, #tpu.memory_space<vmem>>, vector<8x8xf32>,
    %39 = vector.extract_strided_slice %34 {offsets = [8, 0], sizes = [8, 8], strides = [1, 1]} : vector<32x8xf32> to vector<8x8xf32>
    %40 = vector.extract_strided_slice %7 {offsets = [0, 8], sizes = [8, 8], strides = [1, 1]} : vector<8x32xf32> to vector<8x8xf32>
    %cst_24 = arith.constant dense<0.000000e+00> : vector<8x8xf32>
    %41 = tpu.matmul %39, %40, %cst_24 {dimension_numbers = #tpu.dot_dimension_numbers<[1], [0], [0], [1], [0, 0, 1, 1], [], []>} : vector<8x8xf32>, vector<8x8xf32>, vector<8x8xf32> -> vector<8x8xf32>
    %c0_25 = arith.constant 0 : index
    %c8_26 = arith.constant 8 : index
    %42 = vector.load %arg10[%c0_25, %c8_26] : memref<8x32xf32, #tpu.memory_space<vmem>>, vector<8x8xf32>
    tpu.vector_store %arg10[%c0_25, %c8_26], %41 {strides = array<i32>} : memref<8x32xf32, #tpu.memory_space<vmem>>, vector<8x8xf32>,
    %43 = vector.extract_strided_slice %34 {offsets = [16, 0], sizes = [8, 8], strides = [1, 1]} : vector<32x8xf32> to vector<8x8xf32>
    %44 = vector.extract_strided_slice %7 {offsets = [0, 16], sizes = [8, 8], strides = [1, 1]} : vector<8x32xf32> to vector<8x8xf32>
    %cst_27 = arith.constant dense<0.000000e+00> : vector<8x8xf32>
    %45 = tpu.matmul %43, %44, %cst_27 {dimension_numbers = #tpu.dot_dimension_numbers<[1], [0], [0], [1], [0, 0, 1, 1], [], []>} : vector<8x8xf32>, vector<8x8xf32>, vector<8x8xf32> -> vector<8x8xf32>
    %c0_28 = arith.constant 0 : index
    %c16_29 = arith.constant 16 : index
    %46 = vector.load %arg10[%c0_28, %c16_29] : memref<8x32xf32, #tpu.memory_space<vmem>>, vector<8x8xf32>
    tpu.vector_store %arg10[%c0_28, %c16_29], %45 {strides = array<i32>} : memref<8x32xf32, #tpu.memory_space<vmem>>, vector<8x8xf32>,
    %47 = vector.extract_strided_slice %34 {offsets = [24, 0], sizes = [8, 8], strides = [1, 1]} : vector<32x8xf32> to vector<8x8xf32>
    %48 = vector.extract_strided_slice %7 {offsets = [0, 24], sizes = [8, 8], strides = [1, 1]} : vector<8x32xf32> to vector<8x8xf32>
    %cst_30 = arith.constant dense<0.000000e+00> : vector<8x8xf32>
    %49 = tpu.matmul %47, %48, %cst_30 {dimension_numbers = #tpu.dot_dimension_numbers<[1], [0], [0], [1], [0, 0, 1, 1], [], []>} : vector<8x8xf32>, vector<8x8xf32>, vector<8x8xf32> -> vector<8x8xf32>
    %c0_31 = arith.constant 0 : index
    %c24_32 = arith.constant 24 : index
    %50 = vector.load %arg10[%c0_31, %c24_32] : memref<8x32xf32, #tpu.memory_space<vmem>>, vector<8x8xf32>
    tpu.vector_store %arg10[%c0_31, %c24_32], %49 {strides = array<i32>} : memref<8x32xf32, #tpu.memory_space<vmem>>, vector<8x8xf32>,
    %c0_33 = arith.constant 0 : index
    %c0_34 = arith.constant 0 : index
    %51 = vector.load %arg10[%c0_33, %c0_34] : memref<8x32xf32, #tpu.memory_space<vmem>>, vector<8x32xf32>
    %c0_35 = arith.constant 0 : index
    %c0_36 = arith.constant 0 : index
    %52 = vector.load %arg5[%c0_35, %c0_36] : memref<32x32xf32, #tpu.memory_space<vmem>>, vector<32x32xf32>
    %cst_37 = arith.constant dense<0.000000e+00> : vector<8x32xf32>
    %53 = tpu.matmul %51, %52, %cst_37 {dimension_numbers = #tpu.dot_dimension_numbers<[1], [0], [0], [1], [0, 0, 1, 1], [], []>} : vector<8x32xf32>, vector<32x32xf32>, vector<8x32xf32> -> vector<8x32xf32>
    %54 = arith.addf %53, %0 : vector<8x32xf32>
    %c0_38 = arith.constant 0 : index
    %c0_39 = arith.constant 0 : index
    %55 = vector.load %arg6[%c0_38, %c0_39] : memref<1x32xf32, #tpu.memory_space<vmem>>, vector<1x32xf32>
    %c0_40 = arith.constant 0 : index
    %c0_41 = arith.constant 0 : index
    %56 = vector.load %arg7[%c0_40, %c0_41] : memref<1x32xf32, #tpu.memory_space<vmem>>, vector<1x32xf32>
    %cst_42 = arith.constant dense<0.000000e+00> : vector<8xf32>
    %57 = vector.multi_reduction <add>, %54, %cst_42 [1] : vector<8x32xf32> to vector<8xf32>
    %58 = vector.shape_cast %57 : vector<8xf32> to vector<8x1xf32>
    %cst_43 = arith.constant 3.200000e+01 : f32
    %59 = vector.broadcast %cst_43 : f32 to vector<8x1xf32>
    %60 = arith.divf %58, %59 : vector<8x1xf32>
    %61 = vector.broadcast %60 : vector<8x1xf32> to vector<8x32xf32>
    %62 = arith.subf %54, %61 : vector<8x32xf32>
    %63 = arith.mulf %62, %62 : vector<8x32xf32>
    %cst_44 = arith.constant dense<0.000000e+00> : vector<8xf32>
    %64 = vector.multi_reduction <add>, %63, %cst_44 [1] : vector<8x32xf32> to vector<8xf32>
    %65 = vector.shape_cast %64 : vector<8xf32> to vector<8x1xf32>
    %cst_45 = arith.constant 3.200000e+01 : f32
    %66 = vector.broadcast %cst_45 : f32 to vector<8x1xf32>
    %67 = arith.divf %65, %66 : vector<8x1xf32>
    %68 = vector.broadcast %60 : vector<8x1xf32> to vector<8x32xf32>
    %69 = arith.subf %54, %68 : vector<8x32xf32>
    %cst_46 = arith.constant 9.99999997E-7 : f32
    %70 = vector.broadcast %cst_46 : f32 to vector<8x1xf32>
    %71 = arith.addf %67, %70 : vector<8x1xf32>
    %72 = math.rsqrt %71 : vector<8x1xf32>
    %73 = vector.broadcast %72 : vector<8x1xf32> to vector<8x32xf32>
    %74 = arith.mulf %69, %73 : vector<8x32xf32>
    %75 = vector.broadcast %55 : vector<1x32xf32> to vector<8x32xf32>
    %76 = arith.mulf %74, %75 : vector<8x32xf32>
    %77 = vector.broadcast %56 : vector<1x32xf32> to vector<8x32xf32>
    %78 = arith.addf %76, %77 : vector<8x32xf32>
    %c0_47 = arith.constant 0 : index
    %c0_48 = arith.constant 0 : index
    %79 = vector.load %arg8[%c0_47, %c0_48] : memref<8x32xf32, #tpu.memory_space<vmem>>, vector<8x32xf32>
    tpu.vector_store %arg8[%c0_47, %c0_48], %78 {strides = array<i32>} : memref<8x32xf32, #tpu.memory_space<vmem>>, vector<8x32xf32>,
    return
  }
  func.func @transform_0(%arg0: i32) -> (i32, i32) {
    %c0_i32 = arith.constant 0 : i32
    %c0_i32_0 = arith.constant 0 : i32
    return %arg0, %c0_i32 : i32, i32
  }
  func.func @transform_1(%arg0: i32) -> (i32, i32) {
    %c0_i32 = arith.constant 0 : i32
    %c0_i32_0 = arith.constant 0 : i32
    return %arg0, %c0_i32 : i32, i32
  }
  func.func @transform_2(%arg0: i32) -> (i32, i32) {
    %c0_i32 = arith.constant 0 : i32
    %c0_i32_0 = arith.constant 0 : i32
    %c0_i32_1 = arith.constant 0 : i32
    return %c0_i32, %c0_i32_0 : i32, i32
  }
  func.func @transform_3(%arg0: i32) -> (i32, i32) {
    %c0_i32 = arith.constant 0 : i32
    %c0_i32_0 = arith.constant 0 : i32
    %c0_i32_1 = arith.constant 0 : i32
    return %c0_i32, %c0_i32_0 : i32, i32
  }
  func.func @transform_4(%arg0: i32) -> (i32, i32) {
    %c0_i32 = arith.constant 0 : i32
    %c0_i32_0 = arith.constant 0 : i32
    %c0_i32_1 = arith.constant 0 : i32
    return %c0_i32, %c0_i32_0 : i32, i32
  }
  func.func @transform_5(%arg0: i32) -> (i32, i32) {
    %c0_i32 = arith.constant 0 : i32
    %c0_i32_0 = arith.constant 0 : i32
    %c0_i32_1 = arith.constant 0 : i32
    return %c0_i32, %c0_i32_0 : i32, i32
  }
  func.func @transform_6(%arg0: i32) -> (i32, i32) {
    %c0_i32 = arith.constant 0 : i32
    %c0_i32_0 = arith.constant 0 : i32
    %c0_i32_1 = arith.constant 0 : i32
    return %c0_i32, %c0_i32_0 : i32, i32
  }
  func.func @transform_7(%arg0: i32) -> (i32, i32) {
    %c0_i32 = arith.constant 0 : i32
    %c0_i32_0 = arith.constant 0 : i32
    return %arg0, %c0_i32 : i32, i32
  }
}

module attributes {stable_mosaic.version = 11 : i64} {
  func.func @kernel(%arg0: i32, %arg1: memref<8x32xf32, #tpu.memory_space<vmem>>, %arg2: memref<32x64xf32, #tpu.memory_space<vmem>>, %arg3: memref<1x64xf32, #tpu.memory_space<vmem>>, %arg4: memref<64x32xf32, #tpu.memory_space<vmem>>, %arg5: memref<1x32xf32, #tpu.memory_space<vmem>>, %arg6: memref<1x32xf32, #tpu.memory_space<vmem>>, %arg7: memref<1x32xf32, #tpu.memory_space<vmem>>, %arg8: memref<8x32xf32, #tpu.memory_space<vmem>>) attributes {dimension_semantics = [#tpu.dimension_semantics<parallel>], iteration_bounds = array<i64: 2>, scalar_prefetch = 0 : i64, scratch_operands = 0 : i64, tpu.core_type = #tpu.core_type<tc>, window_params = [{transform_indices = @transform_0, window_bounds = array<i64: 8, 32>}, {pipeline_mode = #tpu.pipeline_mode<synchronous>, transform_indices = @transform_1, window_bounds = array<i64: 32, 64>}, {pipeline_mode = #tpu.pipeline_mode<synchronous>, transform_indices = @transform_2, window_bounds = array<i64: 1, 64>}, {pipeline_mode = #tpu.pipeline_mode<synchronous>, transform_indices = @transform_3, window_bounds = array<i64: 64, 32>}, {pipeline_mode = #tpu.pipeline_mode<synchronous>, transform_indices = @transform_4, window_bounds = array<i64: 1, 32>}, {pipeline_mode = #tpu.pipeline_mode<synchronous>, transform_indices = @transform_5, window_bounds = array<i64: 1, 32>}, {pipeline_mode = #tpu.pipeline_mode<synchronous>, transform_indices = @transform_6, window_bounds = array<i64: 1, 32>}, {transform_indices = @transform_7, window_bounds = array<i64: 8, 32>}]} {
    %c0 = arith.constant 0 : index
    %c0_0 = arith.constant 0 : index
    %0 = vector.load %arg1[%c0, %c0_0] : memref<8x32xf32, #tpu.memory_space<vmem>>, vector<8x32xf32>
    %c0_1 = arith.constant 0 : index
    %c0_2 = arith.constant 0 : index
    %1 = vector.load %arg2[%c0_1, %c0_2] : memref<32x64xf32, #tpu.memory_space<vmem>>, vector<32x64xf32>
    %cst = arith.constant dense<0.000000e+00> : vector<8x64xf32>
    %2 = tpu.matmul %0, %1, %cst {dimension_numbers = #tpu.dot_dimension_numbers<[1], [0], [0], [1], [0, 0, 1, 1], [], []>} : vector<8x32xf32>, vector<32x64xf32>, vector<8x64xf32> -> vector<8x64xf32>
    %c0_3 = arith.constant 0 : index
    %c0_4 = arith.constant 0 : index
    %3 = vector.load %arg3[%c0_3, %c0_4] : memref<1x64xf32, #tpu.memory_space<vmem>>, vector<1x64xf32>
    %4 = vector.broadcast %3 : vector<1x64xf32> to vector<8x64xf32>
    %5 = arith.addf %2, %4 : vector<8x64xf32>
    %cst_5 = arith.constant 5.000000e-01 : f32
    %6 = vector.broadcast %cst_5 : f32 to vector<8x64xf32>
    %7 = arith.mulf %6, %5 : vector<8x64xf32>
    %cst_6 = arith.constant 0.707106769 : f32
    %8 = vector.broadcast %cst_6 : f32 to vector<8x64xf32>
    %9 = arith.mulf %5, %8 : vector<8x64xf32>
    %cst_7 = arith.constant -4.000000e+00 : f32
    %cst_8 = arith.constant 4.000000e+00 : f32
    %10 = vector.broadcast %cst_7 : f32 to vector<8x64xf32>
    %11 = arith.maximumf %10, %9 : vector<8x64xf32>
    %12 = vector.broadcast %cst_8 : f32 to vector<8x64xf32>
    %13 = arith.minimumf %12, %11 : vector<8x64xf32>
    %14 = arith.mulf %13, %13 : vector<8x64xf32>
    %cst_9 = arith.constant -2.72614237E-10 : f32
    %15 = vector.broadcast %cst_9 : f32 to vector<8x64xf32>
    %16 = arith.mulf %15, %14 : vector<8x64xf32>
    %cst_10 = arith.constant 2.77068146E-8 : f32
    %17 = vector.broadcast %cst_10 : f32 to vector<8x64xf32>
    %18 = arith.addf %16, %17 : vector<8x64xf32>
    %19 = arith.mulf %18, %14 : vector<8x64xf32>
    %cst_11 = arith.constant -2.10102394E-6 : f32
    %20 = vector.broadcast %cst_11 : f32 to vector<8x64xf32>
    %21 = arith.addf %19, %20 : vector<8x64xf32>
    %22 = arith.mulf %21, %14 : vector<8x64xf32>
    %cst_12 = arith.constant -5.69250624E-5 : f32
    %23 = vector.broadcast %cst_12 : f32 to vector<8x64xf32>
    %24 = arith.addf %22, %23 : vector<8x64xf32>
    %25 = arith.mulf %24, %14 : vector<8x64xf32>
    %cst_13 = arith.constant -7.34990637E-4 : f32
    %26 = vector.broadcast %cst_13 : f32 to vector<8x64xf32>
    %27 = arith.addf %25, %26 : vector<8x64xf32>
    %28 = arith.mulf %27, %14 : vector<8x64xf32>
    %cst_14 = arith.constant -2.954600e-03 : f32
    %29 = vector.broadcast %cst_14 : f32 to vector<8x64xf32>
    %30 = arith.addf %28, %29 : vector<8x64xf32>
    %31 = arith.mulf %30, %14 : vector<8x64xf32>
    %cst_15 = arith.constant -0.0160960332 : f32
    %32 = vector.broadcast %cst_15 : f32 to vector<8x64xf32>
    %33 = arith.addf %31, %32 : vector<8x64xf32>
    %cst_16 = arith.constant -1.45660715E-5 : f32
    %34 = vector.broadcast %cst_16 : f32 to vector<8x64xf32>
    %35 = arith.mulf %34, %14 : vector<8x64xf32>
    %cst_17 = arith.constant -2.13374049E-4 : f32
    %36 = vector.broadcast %cst_17 : f32 to vector<8x64xf32>
    %37 = arith.addf %35, %36 : vector<8x64xf32>
    %38 = arith.mulf %37, %14 : vector<8x64xf32>
    %cst_18 = arith.constant -0.00168282702 : f32
    %39 = vector.broadcast %cst_18 : f32 to vector<8x64xf32>
    %40 = arith.addf %38, %39 : vector<8x64xf32>
    %41 = arith.mulf %40, %14 : vector<8x64xf32>
    %cst_19 = arith.constant -0.00737332925 : f32
    %42 = vector.broadcast %cst_19 : f32 to vector<8x64xf32>
    %43 = arith.addf %41, %42 : vector<8x64xf32>
    %44 = arith.mulf %43, %14 : vector<8x64xf32>
    %cst_20 = arith.constant -0.0142647391 : f32
    %45 = vector.broadcast %cst_20 : f32 to vector<8x64xf32>
    %46 = arith.addf %44, %45 : vector<8x64xf32>
    %47 = arith.mulf %13, %33 : vector<8x64xf32>
    %48 = arith.divf %47, %46 : vector<8x64xf32>
    %cst_21 = arith.constant 1.000000e+00 : f32
    %49 = vector.broadcast %cst_21 : f32 to vector<8x64xf32>
    %50 = arith.addf %49, %48 : vector<8x64xf32>
    %51 = arith.mulf %7, %50 : vector<8x64xf32>
    %c0_22 = arith.constant 0 : index
    %c0_23 = arith.constant 0 : index
    %52 = vector.load %arg4[%c0_22, %c0_23] : memref<64x32xf32, #tpu.memory_space<vmem>>, vector<64x32xf32>
    %cst_24 = arith.constant dense<0.000000e+00> : vector<8x32xf32>
    %53 = tpu.matmul %51, %52, %cst_24 {dimension_numbers = #tpu.dot_dimension_numbers<[1], [0], [0], [1], [0, 0, 1, 1], [], []>} : vector<8x64xf32>, vector<64x32xf32>, vector<8x32xf32> -> vector<8x32xf32>
    %c0_25 = arith.constant 0 : index
    %c0_26 = arith.constant 0 : index
    %54 = vector.load %arg5[%c0_25, %c0_26] : memref<1x32xf32, #tpu.memory_space<vmem>>, vector<1x32xf32>
    %55 = vector.broadcast %54 : vector<1x32xf32> to vector<8x32xf32>
    %56 = arith.addf %53, %55 : vector<8x32xf32>
    %57 = arith.addf %56, %0 : vector<8x32xf32>
    %c0_27 = arith.constant 0 : index
    %c0_28 = arith.constant 0 : index
    %58 = vector.load %arg6[%c0_27, %c0_28] : memref<1x32xf32, #tpu.memory_space<vmem>>, vector<1x32xf32>
    %c0_29 = arith.constant 0 : index
    %c0_30 = arith.constant 0 : index
    %59 = vector.load %arg7[%c0_29, %c0_30] : memref<1x32xf32, #tpu.memory_space<vmem>>, vector<1x32xf32>
    %cst_31 = arith.constant dense<0.000000e+00> : vector<8xf32>
    %60 = vector.multi_reduction <add>, %57, %cst_31 [1] : vector<8x32xf32> to vector<8xf32>
    %61 = vector.shape_cast %60 : vector<8xf32> to vector<8x1xf32>
    %cst_32 = arith.constant 3.200000e+01 : f32
    %62 = vector.broadcast %cst_32 : f32 to vector<8x1xf32>
    %63 = arith.divf %61, %62 : vector<8x1xf32>
    %64 = vector.broadcast %63 : vector<8x1xf32> to vector<8x32xf32>
    %65 = arith.subf %57, %64 : vector<8x32xf32>
    %66 = arith.mulf %65, %65 : vector<8x32xf32>
    %cst_33 = arith.constant dense<0.000000e+00> : vector<8xf32>
    %67 = vector.multi_reduction <add>, %66, %cst_33 [1] : vector<8x32xf32> to vector<8xf32>
    %68 = vector.shape_cast %67 : vector<8xf32> to vector<8x1xf32>
    %cst_34 = arith.constant 3.200000e+01 : f32
    %69 = vector.broadcast %cst_34 : f32 to vector<8x1xf32>
    %70 = arith.divf %68, %69 : vector<8x1xf32>
    %71 = vector.broadcast %63 : vector<8x1xf32> to vector<8x32xf32>
    %72 = arith.subf %57, %71 : vector<8x32xf32>
    %cst_35 = arith.constant 9.99999997E-7 : f32
    %73 = vector.broadcast %cst_35 : f32 to vector<8x1xf32>
    %74 = arith.addf %70, %73 : vector<8x1xf32>
    %75 = math.rsqrt %74 : vector<8x1xf32>
    %76 = vector.broadcast %75 : vector<8x1xf32> to vector<8x32xf32>
    %77 = arith.mulf %72, %76 : vector<8x32xf32>
    %78 = vector.broadcast %58 : vector<1x32xf32> to vector<8x32xf32>
    %79 = arith.mulf %77, %78 : vector<8x32xf32>
    %80 = vector.broadcast %59 : vector<1x32xf32> to vector<8x32xf32>
    %81 = arith.addf %79, %80 : vector<8x32xf32>
    %c0_36 = arith.constant 0 : index
    %c0_37 = arith.constant 0 : index
    %82 = vector.load %arg8[%c0_36, %c0_37] : memref<8x32xf32, #tpu.memory_space<vmem>>, vector<8x32xf32>
    tpu.vector_store %arg8[%c0_36, %c0_37], %81 {strides = array<i32>} : memref<8x32xf32, #tpu.memory_space<vmem>>, vector<8x32xf32>,
    return
  }
  func.func @transform_0(%arg0: i32) -> (i32, i32) {
    %c0_i32 = arith.constant 0 : i32
    %c0_i32_0 = arith.constant 0 : i32
    return %arg0, %c0_i32 : i32, i32
  }
  func.func @transform_1(%arg0: i32) -> (i32, i32) {
    %c0_i32 = arith.constant 0 : i32
    %c0_i32_0 = arith.constant 0 : i32
    %c0_i32_1 = arith.constant 0 : i32
    return %c0_i32, %c0_i32_0 : i32, i32
  }
  func.func @transform_2(%arg0: i32) -> (i32, i32) {
    %c0_i32 = arith.constant 0 : i32
    %c0_i32_0 = arith.constant 0 : i32
    %c0_i32_1 = arith.constant 0 : i32
    return %c0_i32, %c0_i32_0 : i32, i32
  }
  func.func @transform_3(%arg0: i32) -> (i32, i32) {
    %c0_i32 = arith.constant 0 : i32
    %c0_i32_0 = arith.constant 0 : i32
    %c0_i32_1 = arith.constant 0 : i32
    return %c0_i32, %c0_i32_0 : i32, i32
  }
  func.func @transform_4(%arg0: i32) -> (i32, i32) {
    %c0_i32 = arith.constant 0 : i32
    %c0_i32_0 = arith.constant 0 : i32
    %c0_i32_1 = arith.constant 0 : i32
    return %c0_i32, %c0_i32_0 : i32, i32
  }
  func.func @transform_5(%arg0: i32) -> (i32, i32) {
    %c0_i32 = arith.constant 0 : i32
    %c0_i32_0 = arith.constant 0 : i32
    %c0_i32_1 = arith.constant 0 : i32
    return %c0_i32, %c0_i32_0 : i32, i32
  }
  func.func @transform_6(%arg0: i32) -> (i32, i32) {
    %c0_i32 = arith.constant 0 : i32
    %c0_i32_0 = arith.constant 0 : i32
    %c0_i32_1 = arith.constant 0 : i32
    return %c0_i32, %c0_i32_0 : i32, i32
  }
  func.func @transform_7(%arg0: i32) -> (i32, i32) {
    %c0_i32 = arith.constant 0 : i32
    %c0_i32_0 = arith.constant 0 : i32
    return %arg0, %c0_i32 : i32, i32
  }
}

module attributes {stable_mosaic.version = 11 : i64} {
  func.func @kernel(%arg0: i32, %arg1: memref<8x32xf32, #tpu.memory_space<vmem>>, %arg2: memref<16x32xf32, #tpu.memory_space<vmem>>, %arg3: memref<32x32xf32, #tpu.memory_space<vmem>>, %arg4: memref<32x64xf32, #tpu.memory_space<vmem>>, %arg5: memref<32x32xf32, #tpu.memory_space<vmem>>, %arg6: memref<1x32xf32, #tpu.memory_space<vmem>>, %arg7: memref<1x32xf32, #tpu.memory_space<vmem>>, %arg8: memref<32x16xf32, #tpu.memory_space<vmem>>, %arg9: memref<8x32xf32, #tpu.memory_space<vmem>>, %arg10: memref<32x16xf32, #tpu.memory_space<vmem>>, %arg11: memref<8x32xf32, #tpu.memory_space<vmem>>) attributes {dimension_semantics = [#tpu.dimension_semantics<parallel>], iteration_bounds = array<i64: 2>, scalar_prefetch = 0 : i64, scratch_operands = 2 : i64, tpu.core_type = #tpu.core_type<tc>, window_params = [{transform_indices = @transform_0, window_bounds = array<i64: 8, 32>}, {transform_indices = @transform_1, window_bounds = array<i64: 16, 32>}, {pipeline_mode = #tpu.pipeline_mode<synchronous>, transform_indices = @transform_2, window_bounds = array<i64: 32, 32>}, {pipeline_mode = #tpu.pipeline_mode<synchronous>, transform_indices = @transform_3, window_bounds = array<i64: 32, 64>}, {pipeline_mode = #tpu.pipeline_mode<synchronous>, transform_indices = @transform_4, window_bounds = array<i64: 32, 32>}, {pipeline_mode = #tpu.pipeline_mode<synchronous>, transform_indices = @transform_5, window_bounds = array<i64: 1, 32>}, {pipeline_mode = #tpu.pipeline_mode<synchronous>, transform_indices = @transform_6, window_bounds = array<i64: 1, 32>}, {pipeline_mode = #tpu.pipeline_mode<synchronous>, transform_indices = @transform_7, window_bounds = array<i64: 32, 16>}, {transform_indices = @transform_8, window_bounds = array<i64: 8, 32>}]} {
    %c0 = arith.constant 0 : index
    %c0_0 = arith.constant 0 : index
    %0 = vector.load %arg1[%c0, %c0_0] : memref<8x32xf32, #tpu.memory_space<vmem>>, vector<8x32xf32>
    %c0_1 = arith.constant 0 : index
    %c0_2 = arith.constant 0 : index
    %1 = vector.load %arg2[%c0_1, %c0_2] : memref<16x32xf32, #tpu.memory_space<vmem>>, vector<16x32xf32>
    %c0_3 = arith.constant 0 : index
    %c0_4 = arith.constant 0 : index
    %2 = vector.load %arg3[%c0_3, %c0_4] : memref<32x32xf32, #tpu.memory_space<vmem>>, vector<32x32xf32>
    %cst = arith.constant dense<0.000000e+00> : vector<8x32xf32>
    %3 = tpu.matmul %0, %2, %cst {dimension_numbers = #tpu.dot_dimension_numbers<[1], [0], [0], [1], [0, 0, 1, 1], [], []>} : vector<8x32xf32>, vector<32x32xf32>, vector<8x32xf32> -> vector<8x32xf32>
    %c0_5 = arith.constant 0 : index
    %c0_6 = arith.constant 0 : index
    %4 = vector.load %arg4[%c0_5, %c0_6] : memref<32x64xf32, #tpu.memory_space<vmem>>, vector<32x64xf32>
    %cst_7 = arith.constant dense<0.000000e+00> : vector<16x64xf32>
    %5 = tpu.matmul %1, %4, %cst_7 {dimension_numbers = #tpu.dot_dimension_numbers<[1], [0], [0], [1], [0, 0, 1, 1], [], []>} : vector<16x32xf32>, vector<32x64xf32>, vector<16x64xf32> -> vector<16x64xf32>
    %6 = vector.extract_strided_slice %5 {offsets = [0, 0], sizes = [16, 32], strides = [1, 1]} : vector<16x64xf32> to vector<16x32xf32>
    %7 = vector.extract_strided_slice %5 {offsets = [0, 32], sizes = [16, 32], strides = [1, 1]} : vector<16x64xf32> to vector<16x32xf32>
    %8 = vector.extract_strided_slice %3 {offsets = [0, 0], sizes = [8, 8], strides = [1, 1]} : vector<8x32xf32> to vector<8x8xf32>
    %9 = vector.extract_strided_slice %6 {offsets = [0, 0], sizes = [16, 8], strides = [1, 1]} : vector<16x32xf32> to vector<16x8xf32>
    %cst_8 = arith.constant dense<0.000000e+00> : vector<8x16xf32>
    %10 = tpu.matmul %8, %9, %cst_8 {dimension_numbers = #tpu.dot_dimension_numbers<[1], [1], [0], [0], [0, 0, 1, 0], [], []>} : vector<8x8xf32>, vector<16x8xf32>, vector<8x16xf32> -> vector<8x16xf32>
    %c0_9 = arith.constant 0 : index
    %c0_10 = arith.constant 0 : index
    %11 = vector.load %arg10[%c0_9, %c0_10] : memref<32x16xf32, #tpu.memory_space<vmem>>, vector<8x16xf32>
    tpu.vector_store %arg10[%c0_9, %c0_10], %10 {strides = array<i32>} : memref<32x16xf32, #tpu.memory_space<vmem>>, vector<8x16xf32>,
    %12 = vector.extract_strided_slice %3 {offsets = [0, 8], sizes = [8, 8], strides = [1, 1]} : vector<8x32xf32> to vector<8x8xf32>
    %13 = vector.extract_strided_slice %6 {offsets = [0, 8], sizes = [16, 8], strides = [1, 1]} : vector<16x32xf32> to vector<16x8xf32>
    %cst_11 = arith.constant dense<0.000000e+00> : vector<8x16xf32>
    %14 = tpu.matmul %12, %13, %cst_11 {dimension_numbers = #tpu.dot_dimension_numbers<[1], [1], [0], [0], [0, 0, 1, 0], [], []>} : vector<8x8xf32>, vector<16x8xf32>, vector<8x16xf32> -> vector<8x16xf32>
    %c8 = arith.constant 8 : index
    %c0_12 = arith.constant 0 : index
    %15 = vector.load %arg10[%c8, %c0_12] : memref<32x16xf32, #tpu.memory_space<vmem>>, vector<8x16xf32>
    tpu.vector_store %arg10[%c8, %c0_12], %14 {strides = array<i32>} : memref<32x16xf32, #tpu.memory_space<vmem>>, vector<8x16xf32>,
    %16 = vector.extract_strided_slice %3 {offsets = [0, 16], sizes = [8, 8], strides = [1, 1]} : vector<8x32xf32> to vector<8x8xf32>
    %17 = vector.extract_strided_slice %6 {offsets = [0, 16], sizes = [16, 8], strides = [1, 1]} : vector<16x32xf32> to vector<16x8xf32>
    %cst_13 = arith.constant dense<0.000000e+00> : vector<8x16xf32>
    %18 = tpu.matmul %16, %17, %cst_13 {dimension_numbers = #tpu.dot_dimension_numbers<[1], [1], [0], [0], [0, 0, 1, 0], [], []>} : vector<8x8xf32>, vector<16x8xf32>, vector<8x16xf32> -> vector<8x16xf32>
    %c16 = arith.constant 16 : index
    %c0_14 = arith.constant 0 : index
    %19 = vector.load %arg10[%c16, %c0_14] : memref<32x16xf32, #tpu.memory_space<vmem>>, vector<8x16xf32>
    tpu.vector_store %arg10[%c16, %c0_14], %18 {strides = array<i32>} : memref<32x16xf32, #tpu.memory_space<vmem>>, vector<8x16xf32>,
    %20 = vector.extract_strided_slice %3 {offsets = [0, 24], sizes = [8, 8], strides = [1, 1]} : vector<8x32xf32> to vector<8x8xf32>
    %21 = vector.extract_strided_slice %6 {offsets = [0, 24], sizes = [16, 8], strides = [1, 1]} : vector<16x32xf32> to vector<16x8xf32>
    %cst_15 = arith.constant dense<0.000000e+00> : vector<8x16xf32>
    %22 = tpu.matmul %20, %21, %cst_15 {dimension_numbers = #tpu.dot_dimension_numbers<[1], [1], [0], [0], [0, 0, 1, 0], [], []>} : vector<8x8xf32>, vector<16x8xf32>, vector<8x16xf32> -> vector<8x16xf32>
    %c24 = arith.constant 24 : index
    %c0_16 = arith.constant 0 : index
    %23 = vector.load %arg10[%c24, %c0_16] : memref<32x16xf32, #tpu.memory_space<vmem>>, vector<8x16xf32>
    tpu.vector_store %arg10[%c24, %c0_16], %22 {strides = array<i32>} : memref<32x16xf32, #tpu.memory_space<vmem>>, vector<8x16xf32>,
    %c0_17 = arith.constant 0 : index
    %c0_18 = arith.constant 0 : index
    %24 = vector.load %arg10[%c0_17, %c0_18] : memref<32x16xf32, #tpu.memory_space<vmem>>, vector<32x16xf32>
    %c0_19 = arith.constant 0 : index
    %c0_20 = arith.constant 0 : index
    %25 = vector.load %arg8[%c0_19, %c0_20] : memref<32x16xf32, #tpu.memory_space<vmem>>, vector<32x16xf32>
    %26 = arith.addf %24, %25 : vector<32x16xf32>
    %cst_21 = arith.constant dense<0xFF800000> : vector<32xf32>
    %27 = vector.multi_reduction <maximumf>, %26, %cst_21 [1] : vector<32x16xf32> to vector<32xf32>
    %28 = vector.shape_cast %27 : vector<32xf32> to vector<32x1xf32>
    %29 = vector.broadcast %28 : vector<32x1xf32> to vector<32x16xf32>
    %30 = arith.subf %26, %29 : vector<32x16xf32>
    %31 = math.exp %30 : vector<32x16xf32>
    %cst_22 = arith.constant dense<0.000000e+00> : vector<32xf32>
    %32 = vector.multi_reduction <add>, %31, %cst_22 [1] : vector<32x16xf32> to vector<32xf32>
    %33 = vector.shape_cast %32 : vector<32xf32> to vector<32x1xf32>
    %34 = tpu.reciprocal %33 {approx = true} : vector<32x1xf32> -> vector<32x1xf32>
    %35 = vector.broadcast %34 : vector<32x1xf32> to vector<32x16xf32>
    %36 = arith.mulf %31, %35 : vector<32x16xf32>
    %37 = vector.extract_strided_slice %36 {offsets = [0, 0], sizes = [8, 16], strides = [1, 1]} : vector<32x16xf32> to vector<8x16xf32>
    %38 = vector.extract_strided_slice %7 {offsets = [0, 0], sizes = [16, 8], strides = [1, 1]} : vector<16x32xf32> to vector<16x8xf32>
    %cst_23 = arith.constant dense<0.000000e+00> : vector<8x8xf32>
    %39 = tpu.matmul %37, %38, %cst_23 {dimension_numbers = #tpu.dot_dimension_numbers<[1], [0], [0], [1], [0, 0, 1, 1], [], []>} : vector<8x16xf32>, vector<16x8xf32>, vector<8x8xf32> -> vector<8x8xf32>
    %c0_24 = arith.constant 0 : index
    %c0_25 = arith.constant 0 : index
    %40 = vector.load %arg11[%c0_24, %c0_25] : memref<8x32xf32, #tpu.memory_space<vmem>>, vector<8x8xf32>
    tpu.vector_store %arg11[%c0_24, %c0_25], %39 {strides = array<i32>} : memref<8x32xf32, #tpu.memory_space<vmem>>, vector<8x8xf32>,
    %41 = vector.extract_strided_slice %36 {offsets = [8, 0], sizes = [8, 16], strides = [1, 1]} : vector<32x16xf32> to vector<8x16xf32>
    %42 = vector.extract_strided_slice %7 {offsets = [0, 8], sizes = [16, 8], strides = [1, 1]} : vector<16x32xf32> to vector<16x8xf32>
    %cst_26 = arith.constant dense<0.000000e+00> : vector<8x8xf32>
    %43 = tpu.matmul %41, %42, %cst_26 {dimension_numbers = #tpu.dot_dimension_numbers<[1], [0], [0], [1], [0, 0, 1, 1], [], []>} : vector<8x16xf32>, vector<16x8xf32>, vector<8x8xf32> -> vector<8x8xf32>
    %c0_27 = arith.constant 0 : index
    %c8_28 = arith.constant 8 : index
    %44 = vector.load %arg11[%c0_27, %c8_28] : memref<8x32xf32, #tpu.memory_space<vmem>>, vector<8x8xf32>
    tpu.vector_store %arg11[%c0_27, %c8_28], %43 {strides = array<i32>} : memref<8x32xf32, #tpu.memory_space<vmem>>, vector<8x8xf32>,
    %45 = vector.extract_strided_slice %36 {offsets = [16, 0], sizes = [8, 16], strides = [1, 1]} : vector<32x16xf32> to vector<8x16xf32>
    %46 = vector.extract_strided_slice %7 {offsets = [0, 16], sizes = [16, 8], strides = [1, 1]} : vector<16x32xf32> to vector<16x8xf32>
    %cst_29 = arith.constant dense<0.000000e+00> : vector<8x8xf32>
    %47 = tpu.matmul %45, %46, %cst_29 {dimension_numbers = #tpu.dot_dimension_numbers<[1], [0], [0], [1], [0, 0, 1, 1], [], []>} : vector<8x16xf32>, vector<16x8xf32>, vector<8x8xf32> -> vector<8x8xf32>
    %c0_30 = arith.constant 0 : index
    %c16_31 = arith.constant 16 : index
    %48 = vector.load %arg11[%c0_30, %c16_31] : memref<8x32xf32, #tpu.memory_space<vmem>>, vector<8x8xf32>
    tpu.vector_store %arg11[%c0_30, %c16_31], %47 {strides = array<i32>} : memref<8x32xf32, #tpu.memory_space<vmem>>, vector<8x8xf32>,
    %49 = vector.extract_strided_slice %36 {offsets = [24, 0], sizes = [8, 16], strides = [1, 1]} : vector<32x16xf32> to vector<8x16xf32>
    %50 = vector.extract_strided_slice %7 {offsets = [0, 24], sizes = [16, 8], strides = [1, 1]} : vector<16x32xf32> to vector<16x8xf32>
    %cst_32 = arith.constant dense<0.000000e+00> : vector<8x8xf32>
    %51 = tpu.matmul %49, %50, %cst_32 {dimension_numbers = #tpu.dot_dimension_numbers<[1], [0], [0], [1], [0, 0, 1, 1], [], []>} : vector<8x16xf32>, vector<16x8xf32>, vector<8x8xf32> -> vector<8x8xf32>
    %c0_33 = arith.constant 0 : index
    %c24_34 = arith.constant 24 : index
    %52 = vector.load %arg11[%c0_33, %c24_34] : memref<8x32xf32, #tpu.memory_space<vmem>>, vector<8x8xf32>
    tpu.vector_store %arg11[%c0_33, %c24_34], %51 {strides = array<i32>} : memref<8x32xf32, #tpu.memory_space<vmem>>, vector<8x8xf32>,
    %c0_35 = arith.constant 0 : index
    %c0_36 = arith.constant 0 : index
    %53 = vector.load %arg11[%c0_35, %c0_36] : memref<8x32xf32, #tpu.memory_space<vmem>>, vector<8x32xf32>
    %c0_37 = arith.constant 0 : index
    %c0_38 = arith.constant 0 : index
    %54 = vector.load %arg5[%c0_37, %c0_38] : memref<32x32xf32, #tpu.memory_space<vmem>>, vector<32x32xf32>
    %cst_39 = arith.constant dense<0.000000e+00> : vector<8x32xf32>
    %55 = tpu.matmul %53, %54, %cst_39 {dimension_numbers = #tpu.dot_dimension_numbers<[1], [0], [0], [1], [0, 0, 1, 1], [], []>} : vector<8x32xf32>, vector<32x32xf32>, vector<8x32xf32> -> vector<8x32xf32>
    %56 = arith.addf %55, %0 : vector<8x32xf32>
    %c0_40 = arith.constant 0 : index
    %c0_41 = arith.constant 0 : index
    %57 = vector.load %arg6[%c0_40, %c0_41] : memref<1x32xf32, #tpu.memory_space<vmem>>, vector<1x32xf32>
    %c0_42 = arith.constant 0 : index
    %c0_43 = arith.constant 0 : index
    %58 = vector.load %arg7[%c0_42, %c0_43] : memref<1x32xf32, #tpu.memory_space<vmem>>, vector<1x32xf32>
    %cst_44 = arith.constant dense<0.000000e+00> : vector<8xf32>
    %59 = vector.multi_reduction <add>, %56, %cst_44 [1] : vector<8x32xf32> to vector<8xf32>
    %60 = vector.shape_cast %59 : vector<8xf32> to vector<8x1xf32>
    %cst_45 = arith.constant 3.200000e+01 : f32
    %61 = vector.broadcast %cst_45 : f32 to vector<8x1xf32>
    %62 = arith.divf %60, %61 : vector<8x1xf32>
    %63 = vector.broadcast %62 : vector<8x1xf32> to vector<8x32xf32>
    %64 = arith.subf %56, %63 : vector<8x32xf32>
    %65 = arith.mulf %64, %64 : vector<8x32xf32>
    %cst_46 = arith.constant dense<0.000000e+00> : vector<8xf32>
    %66 = vector.multi_reduction <add>, %65, %cst_46 [1] : vector<8x32xf32> to vector<8xf32>
    %67 = vector.shape_cast %66 : vector<8xf32> to vector<8x1xf32>
    %cst_47 = arith.constant 3.200000e+01 : f32
    %68 = vector.broadcast %cst_47 : f32 to vector<8x1xf32>
    %69 = arith.divf %67, %68 : vector<8x1xf32>
    %70 = vector.broadcast %62 : vector<8x1xf32> to vector<8x32xf32>
    %71 = arith.subf %56, %70 : vector<8x32xf32>
    %cst_48 = arith.constant 9.99999997E-7 : f32
    %72 = vector.broadcast %cst_48 : f32 to vector<8x1xf32>
    %73 = arith.addf %69, %72 : vector<8x1xf32>
    %74 = math.rsqrt %73 : vector<8x1xf32>
    %75 = vector.broadcast %74 : vector<8x1xf32> to vector<8x32xf32>
    %76 = arith.mulf %71, %75 : vector<8x32xf32>
    %77 = vector.broadcast %57 : vector<1x32xf32> to vector<8x32xf32>
    %78 = arith.mulf %76, %77 : vector<8x32xf32>
    %79 = vector.broadcast %58 : vector<1x32xf32> to vector<8x32xf32>
    %80 = arith.addf %78, %79 : vector<8x32xf32>
    %c0_49 = arith.constant 0 : index
    %c0_50 = arith.constant 0 : index
    %81 = vector.load %arg9[%c0_49, %c0_50] : memref<8x32xf32, #tpu.memory_space<vmem>>, vector<8x32xf32>
    tpu.vector_store %arg9[%c0_49, %c0_50], %80 {strides = array<i32>} : memref<8x32xf32, #tpu.memory_space<vmem>>, vector<8x32xf32>,
    return
  }
  func.func @transform_0(%arg0: i32) -> (i32, i32) {
    %c0_i32 = arith.constant 0 : i32
    %c0_i32_0 = arith.constant 0 : i32
    return %arg0, %c0_i32 : i32, i32
  }
  func.func @transform_1(%arg0: i32) -> (i32, i32) {
    %c0_i32 = arith.constant 0 : i32
    %c0_i32_0 = arith.constant 0 : i32
    return %arg0, %c0_i32 : i32, i32
  }
  func.func @transform_2(%arg0: i32) -> (i32, i32) {
    %c0_i32 = arith.constant 0 : i32
    %c0_i32_0 = arith.constant 0 : i32
    %c0_i32_1 = arith.constant 0 : i32
    return %c0_i32, %c0_i32_0 : i32, i32
  }
  func.func @transform_3(%arg0: i32) -> (i32, i32) {
    %c0_i32 = arith.constant 0 : i32
    %c0_i32_0 = arith.constant 0 : i32
    %c0_i32_1 = arith.constant 0 : i32
    return %c0_i32, %c0_i32_0 : i32, i32
  }
  func.func @transform_4(%arg0: i32) -> (i32, i32) {
    %c0_i32 = arith.constant 0 : i32
    %c0_i32_0 = arith.constant 0 : i32
    %c0_i32_1 = arith.constant 0 : i32
    return %c0_i32, %c0_i32_0 : i32, i32
  }
  func.func @transform_5(%arg0: i32) -> (i32, i32) {
    %c0_i32 = arith.constant 0 : i32
    %c0_i32_0 = arith.constant 0 : i32
    %c0_i32_1 = arith.constant 0 : i32
    return %c0_i32, %c0_i32_0 : i32, i32
  }
  func.func @transform_6(%arg0: i32) -> (i32, i32) {
    %c0_i32 = arith.constant 0 : i32
    %c0_i32_0 = arith.constant 0 : i32
    %c0_i32_1 = arith.constant 0 : i32
    return %c0_i32, %c0_i32_0 : i32, i32
  }
  func.func @transform_7(%arg0: i32) -> (i32, i32) {
    %c0_i32 = arith.constant 0 : i32
    %c0_i32_0 = arith.constant 0 : i32
    %c0_i32_1 = arith.constant 0 : i32
    return %c0_i32, %c0_i32_0 : i32, i32
  }
  func.func @transform_8(%arg0: i32) -> (i32, i32) {
    %c0_i32 = arith.constant 0 : i32
    %c0_i32_0 = arith.constant 0 : i32
    return %arg0, %c0_i32 : i32, i32
  }
}

module attributes {stable_mosaic.version = 11 : i64} {
  func.func @kernel(%arg0: i32, %arg1: memref<8x32xf32, #tpu.memory_space<vmem>>, %arg2: memref<32x64xf32, #tpu.memory_space<vmem>>, %arg3: memref<1x64xf32, #tpu.memory_space<vmem>>, %arg4: memref<64x32xf32, #tpu.memory_space<vmem>>, %arg5: memref<1x32xf32, #tpu.memory_space<vmem>>, %arg6: memref<1x32xf32, #tpu.memory_space<vmem>>, %arg7: memref<1x32xf32, #tpu.memory_space<vmem>>, %arg8: memref<8x32xf32, #tpu.memory_space<vmem>>) attributes {dimension_semantics = [#tpu.dimension_semantics<parallel>], iteration_bounds = array<i64: 2>, scalar_prefetch = 0 : i64, scratch_operands = 0 : i64, tpu.core_type = #tpu.core_type<tc>, window_params = [{transform_indices = @transform_0, window_bounds = array<i64: 8, 32>}, {pipeline_mode = #tpu.pipeline_mode<synchronous>, transform_indices = @transform_1, window_bounds = array<i64: 32, 64>}, {pipeline_mode = #tpu.pipeline_mode<synchronous>, transform_indices = @transform_2, window_bounds = array<i64: 1, 64>}, {pipeline_mode = #tpu.pipeline_mode<synchronous>, transform_indices = @transform_3, window_bounds = array<i64: 64, 32>}, {pipeline_mode = #tpu.pipeline_mode<synchronous>, transform_indices = @transform_4, window_bounds = array<i64: 1, 32>}, {pipeline_mode = #tpu.pipeline_mode<synchronous>, transform_indices = @transform_5, window_bounds = array<i64: 1, 32>}, {pipeline_mode = #tpu.pipeline_mode<synchronous>, transform_indices = @transform_6, window_bounds = array<i64: 1, 32>}, {transform_indices = @transform_7, window_bounds = array<i64: 8, 32>}]} {
    %c0 = arith.constant 0 : index
    %c0_0 = arith.constant 0 : index
    %0 = vector.load %arg1[%c0, %c0_0] : memref<8x32xf32, #tpu.memory_space<vmem>>, vector<8x32xf32>
    %c0_1 = arith.constant 0 : index
    %c0_2 = arith.constant 0 : index
    %1 = vector.load %arg2[%c0_1, %c0_2] : memref<32x64xf32, #tpu.memory_space<vmem>>, vector<32x64xf32>
    %cst = arith.constant dense<0.000000e+00> : vector<8x64xf32>
    %2 = tpu.matmul %0, %1, %cst {dimension_numbers = #tpu.dot_dimension_numbers<[1], [0], [0], [1], [0, 0, 1, 1], [], []>} : vector<8x32xf32>, vector<32x64xf32>, vector<8x64xf32> -> vector<8x64xf32>
    %c0_3 = arith.constant 0 : index
    %c0_4 = arith.constant 0 : index
    %3 = vector.load %arg3[%c0_3, %c0_4] : memref<1x64xf32, #tpu.memory_space<vmem>>, vector<1x64xf32>
    %4 = vector.broadcast %3 : vector<1x64xf32> to vector<8x64xf32>
    %5 = arith.addf %2, %4 : vector<8x64xf32>
    %cst_5 = arith.constant 5.000000e-01 : f32
    %6 = vector.broadcast %cst_5 : f32 to vector<8x64xf32>
    %7 = arith.mulf %6, %5 : vector<8x64xf32>
    %cst_6 = arith.constant 0.707106769 : f32
    %8 = vector.broadcast %cst_6 : f32 to vector<8x64xf32>
    %9 = arith.mulf %5, %8 : vector<8x64xf32>
    %cst_7 = arith.constant -4.000000e+00 : f32
    %cst_8 = arith.constant 4.000000e+00 : f32
    %10 = vector.broadcast %cst_7 : f32 to vector<8x64xf32>
    %11 = arith.maximumf %10, %9 : vector<8x64xf32>
    %12 = vector.broadcast %cst_8 : f32 to vector<8x64xf32>
    %13 = arith.minimumf %12, %11 : vector<8x64xf32>
    %14 = arith.mulf %13, %13 : vector<8x64xf32>
    %cst_9 = arith.constant -2.72614237E-10 : f32
    %15 = vector.broadcast %cst_9 : f32 to vector<8x64xf32>
    %16 = arith.mulf %15, %14 : vector<8x64xf32>
    %cst_10 = arith.constant 2.77068146E-8 : f32
    %17 = vector.broadcast %cst_10 : f32 to vector<8x64xf32>
    %18 = arith.addf %16, %17 : vector<8x64xf32>
    %19 = arith.mulf %18, %14 : vector<8x64xf32>
    %cst_11 = arith.constant -2.10102394E-6 : f32
    %20 = vector.broadcast %cst_11 : f32 to vector<8x64xf32>
    %21 = arith.addf %19, %20 : vector<8x64xf32>
    %22 = arith.mulf %21, %14 : vector<8x64xf32>
    %cst_12 = arith.constant -5.69250624E-5 : f32
    %23 = vector.broadcast %cst_12 : f32 to vector<8x64xf32>
    %24 = arith.addf %22, %23 : vector<8x64xf32>
    %25 = arith.mulf %24, %14 : vector<8x64xf32>
    %cst_13 = arith.constant -7.34990637E-4 : f32
    %26 = vector.broadcast %cst_13 : f32 to vector<8x64xf32>
    %27 = arith.addf %25, %26 : vector<8x64xf32>
    %28 = arith.mulf %27, %14 : vector<8x64xf32>
    %cst_14 = arith.constant -2.954600e-03 : f32
    %29 = vector.broadcast %cst_14 : f32 to vector<8x64xf32>
    %30 = arith.addf %28, %29 : vector<8x64xf32>
    %31 = arith.mulf %30, %14 : vector<8x64xf32>
    %cst_15 = arith.constant -0.0160960332 : f32
    %32 = vector.broadcast %cst_15 : f32 to vector<8x64xf32>
    %33 = arith.addf %31, %32 : vector<8x64xf32>
    %cst_16 = arith.constant -1.45660715E-5 : f32
    %34 = vector.broadcast %cst_16 : f32 to vector<8x64xf32>
    %35 = arith.mulf %34, %14 : vector<8x64xf32>
    %cst_17 = arith.constant -2.13374049E-4 : f32
    %36 = vector.broadcast %cst_17 : f32 to vector<8x64xf32>
    %37 = arith.addf %35, %36 : vector<8x64xf32>
    %38 = arith.mulf %37, %14 : vector<8x64xf32>
    %cst_18 = arith.constant -0.00168282702 : f32
    %39 = vector.broadcast %cst_18 : f32 to vector<8x64xf32>
    %40 = arith.addf %38, %39 : vector<8x64xf32>
    %41 = arith.mulf %40, %14 : vector<8x64xf32>
    %cst_19 = arith.constant -0.00737332925 : f32
    %42 = vector.broadcast %cst_19 : f32 to vector<8x64xf32>
    %43 = arith.addf %41, %42 : vector<8x64xf32>
    %44 = arith.mulf %43, %14 : vector<8x64xf32>
    %cst_20 = arith.constant -0.0142647391 : f32
    %45 = vector.broadcast %cst_20 : f32 to vector<8x64xf32>
    %46 = arith.addf %44, %45 : vector<8x64xf32>
    %47 = arith.mulf %13, %33 : vector<8x64xf32>
    %48 = arith.divf %47, %46 : vector<8x64xf32>
    %cst_21 = arith.constant 1.000000e+00 : f32
    %49 = vector.broadcast %cst_21 : f32 to vector<8x64xf32>
    %50 = arith.addf %49, %48 : vector<8x64xf32>
    %51 = arith.mulf %7, %50 : vector<8x64xf32>
    %c0_22 = arith.constant 0 : index
    %c0_23 = arith.constant 0 : index
    %52 = vector.load %arg4[%c0_22, %c0_23] : memref<64x32xf32, #tpu.memory_space<vmem>>, vector<64x32xf32>
    %cst_24 = arith.constant dense<0.000000e+00> : vector<8x32xf32>
    %53 = tpu.matmul %51, %52, %cst_24 {dimension_numbers = #tpu.dot_dimension_numbers<[1], [0], [0], [1], [0, 0, 1, 1], [], []>} : vector<8x64xf32>, vector<64x32xf32>, vector<8x32xf32> -> vector<8x32xf32>
    %c0_25 = arith.constant 0 : index
    %c0_26 = arith.constant 0 : index
    %54 = vector.load %arg5[%c0_25, %c0_26] : memref<1x32xf32, #tpu.memory_space<vmem>>, vector<1x32xf32>
    %55 = vector.broadcast %54 : vector<1x32xf32> to vector<8x32xf32>
    %56 = arith.addf %53, %55 : vector<8x32xf32>
    %57 = arith.addf %56, %0 : vector<8x32xf32>
    %c0_27 = arith.constant 0 : index
    %c0_28 = arith.constant 0 : index
    %58 = vector.load %arg6[%c0_27, %c0_28] : memref<1x32xf32, #tpu.memory_space<vmem>>, vector<1x32xf32>
    %c0_29 = arith.constant 0 : index
    %c0_30 = arith.constant 0 : index
    %59 = vector.load %arg7[%c0_29, %c0_30] : memref<1x32xf32, #tpu.memory_space<vmem>>, vector<1x32xf32>
    %cst_31 = arith.constant dense<0.000000e+00> : vector<8xf32>
    %60 = vector.multi_reduction <add>, %57, %cst_31 [1] : vector<8x32xf32> to vector<8xf32>
    %61 = vector.shape_cast %60 : vector<8xf32> to vector<8x1xf32>
    %cst_32 = arith.constant 3.200000e+01 : f32
    %62 = vector.broadcast %cst_32 : f32 to vector<8x1xf32>
    %63 = arith.divf %61, %62 : vector<8x1xf32>
    %64 = vector.broadcast %63 : vector<8x1xf32> to vector<8x32xf32>
    %65 = arith.subf %57, %64 : vector<8x32xf32>
    %66 = arith.mulf %65, %65 : vector<8x32xf32>
    %cst_33 = arith.constant dense<0.000000e+00> : vector<8xf32>
    %67 = vector.multi_reduction <add>, %66, %cst_33 [1] : vector<8x32xf32> to vector<8xf32>
    %68 = vector.shape_cast %67 : vector<8xf32> to vector<8x1xf32>
    %cst_34 = arith.constant 3.200000e+01 : f32
    %69 = vector.broadcast %cst_34 : f32 to vector<8x1xf32>
    %70 = arith.divf %68, %69 : vector<8x1xf32>
    %71 = vector.broadcast %63 : vector<8x1xf32> to vector<8x32xf32>
    %72 = arith.subf %57, %71 : vector<8x32xf32>
    %cst_35 = arith.constant 9.99999997E-7 : f32
    %73 = vector.broadcast %cst_35 : f32 to vector<8x1xf32>
    %74 = arith.addf %70, %73 : vector<8x1xf32>
    %75 = math.rsqrt %74 : vector<8x1xf32>
    %76 = vector.broadcast %75 : vector<8x1xf32> to vector<8x32xf32>
    %77 = arith.mulf %72, %76 : vector<8x32xf32>
    %78 = vector.broadcast %58 : vector<1x32xf32> to vector<8x32xf32>
    %79 = arith.mulf %77, %78 : vector<8x32xf32>
    %80 = vector.broadcast %59 : vector<1x32xf32> to vector<8x32xf32>
    %81 = arith.addf %79, %80 : vector<8x32xf32>
    %c0_36 = arith.constant 0 : index
    %c0_37 = arith.constant 0 : index
    %82 = vector.load %arg8[%c0_36, %c0_37] : memref<8x32xf32, #tpu.memory_space<vmem>>, vector<8x32xf32>
    tpu.vector_store %arg8[%c0_36, %c0_37], %81 {strides = array<i32>} : memref<8x32xf32, #tpu.memory_space<vmem>>, vector<8x32xf32>,
    return
  }
  func.func @transform_0(%arg0: i32) -> (i32, i32) {
    %c0_i32 = arith.constant 0 : i32
    %c0_i32_0 = arith.constant 0 : i32
    return %arg0, %c0_i32 : i32, i32
  }
  func.func @transform_1(%arg0: i32) -> (i32, i32) {
    %c0_i32 = arith.constant 0 : i32
    %c0_i32_0 = arith.constant 0 : i32
    %c0_i32_1 = arith.constant 0 : i32
    return %c0_i32, %c0_i32_0 : i32, i32
  }
  func.func @transform_2(%arg0: i32) -> (i32, i32) {
    %c0_i32 = arith.constant 0 : i32
    %c0_i32_0 = arith.constant 0 : i32
    %c0_i32_1 = arith.constant 0 : i32
    return %c0_i32, %c0_i32_0 : i32, i32
  }
  func.func @transform_3(%arg0: i32) -> (i32, i32) {
    %c0_i32 = arith.constant 0 : i32
    %c0_i32_0 = arith.constant 0 : i32
    %c0_i32_1 = arith.constant 0 : i32
    return %c0_i32, %c0_i32_0 : i32, i32
  }
  func.func @transform_4(%arg0: i32) -> (i32, i32) {
    %c0_i32 = arith.constant 0 : i32
    %c0_i32_0 = arith.constant 0 : i32
    %c0_i32_1 = arith.constant 0 : i32
    return %c0_i32, %c0_i32_0 : i32, i32
  }
  func.func @transform_5(%arg0: i32) -> (i32, i32) {
    %c0_i32 = arith.constant 0 : i32
    %c0_i32_0 = arith.constant 0 : i32
    %c0_i32_1 = arith.constant 0 : i32
    return %c0_i32, %c0_i32_0 : i32, i32
  }
  func.func @transform_6(%arg0: i32) -> (i32, i32) {
    %c0_i32 = arith.constant 0 : i32
    %c0_i32_0 = arith.constant 0 : i32
    %c0_i32_1 = arith.constant 0 : i32
    return %c0_i32, %c0_i32_0 : i32, i32
  }
  func.func @transform_7(%arg0: i32) -> (i32, i32) {
    %c0_i32 = arith.constant 0 : i32
    %c0_i32_0 = arith.constant 0 : i32
    return %arg0, %c0_i32 : i32, i32
  }
}

</mosaic_0001>

<bundles_post_ra>
// kernel: _lambda_.5
= control target key start
LH: loop header
LB: loop body
LE: loop exit
PB: predicated region body
PF: predicated region fallthrough
CT: control target
= control target key end

     0   :  { %s389_s12 = smov 0   ;;  %s415_s0 = inlined_call_operand.vmem [shape: f32[16,16], index: 0, kind: input, shape index: {}]   ;;  %s416_s1 = inlined_call_operand.vmem [shape: f32[16,32], index: 1, kind: input, shape index: {}]   ;;  %s417_s2 = inlined_call_operand.vmem [shape: f32[16,32], index: 2, kind: input, shape index: {}]   ;;  %s418_s3 = inlined_call_operand.vmem [shape: f32[16,32], index: 3, kind: output, shape index: {}]  }
   0x1 LB: > { %s328_s13 = sadd.s32 4294967295, %s365_s12   ;;  %p332_p0 = scmp.ge.s32.totalorder %s365_s12, 1  ;;  %s365_s12 = sphi %s389_s12, %s13_s12  }
   0x2   : > { %p145_p1 = scmp.lt.s32.totalorder %s365_s12, 3 }
   0x4   : > { %p146_p2 = pnand %p332_p0, %p145_p1 }
   0x5   : > { %p171_p3 = scmp.lt.s32.totalorder (!%p146_p2), %s328_s13, 1 }
   0x6   : > { %149 = sbr.rel (%p146_p2) target bundleno = 212 (0xd4), region = 32 }
   0xb   : > { %v185_v0 = vld [vmem:[%s416_s1 + $0x8] sm:$0xff]  ;;  %v367_v1 = vmov 0.0   ;;  %v184_v2 = vld [vmem:[%s416_s1] sm:$0xff]  ;;  %vm368_vm0 = vmmov 0   ;;  %s420_s13 = smov (!%p171_p3, %s328_s13), 1  ;;  %vm187_vm1 = vcmask 130048  }
   0xc   : > { %342 = vmatprep.subr.mxu0 %v367_v1  ;;  %346 = vmatprep.mubr.msk.f32.mxu0 %vm368_vm0, %v367_v1  ;;  %s333_s18 = sshll.u32 %s420_s13, 3  ;;  %vm261_vm2 = vcmask 261120  }
   0xd   : > { %343 = vmatpush3.msra.mxu0 %v185_v0  ;;  %s174_s21 = scalar_lea.vmem %s415_s0, %s333_s18  ;;  %s178_s24 = scalar_lea.vmem %s417_s2, %s333_s18 }
   0xe   : > { %344 = vmatprep.subr.mxu0 %v367_v1  ;;  %v183_v3 = vld [vmem:[%s174_s21] sm:$0xff]  ;;  %s182_s27 = scalar_lea.vmem %s418_s3, %s333_s18 }
   0xf   : > { %345 = vmatpush3.msra.mxu0 %v184_v2  ;;  %v186_v4 = vld [vmem:[%s178_s24] sm:$0xff] }
  0x10   : > { %347 = vmatmul.mubr.msk.f32.vlgmr.msra.gmra.mxu0 %vm187_vm1, %v183_v3 }
  0xd0   : > { %v257_v5 = vpop.f32.mrf.mxu0 }
  0xd1   : > { %v258_v6 = vadd.f32 %v257_v5, %v186_v4 }
  0xd2   : > { %v348_v7 = vpop.f32.mrf.mxu0 }
  0xd3   : > { %262 = vst.msk [vmem:[%s182_s27] sm:$0xff] %vm261_vm2, %v258_v6 }
  0xd4 PF: > { %s13_s12 = sadd.s32 1, %s365_s12  }
  0xd5   : > { %p10_p4 = scmp.ge.s32.totalorder %s13_s12, 4  }
  0xd7   :  { %12 = sbr.rel (!%p10_p4) target bundleno = 1 (0x1), region = 65 }

// kernel: _lambda_.6
= control target key start
LH: loop header
LB: loop body
LE: loop exit
PB: predicated region body
PF: predicated region fallthrough
CT: control target
= control target key end

     0   :  { %s1537_s24 = smov 0   ;;  %s1691_s0 = inlined_call_operand.vmem [shape: f32[16,32], index: 0, kind: input, shape index: {}]   ;;  %s1692_s1 = inlined_call_operand.vmem [shape: f32[16,32], index: 1, kind: input, shape index: {}]   ;;  %s1693_s2 = inlined_call_operand.vmem [shape: f32[32,32], index: 2, kind: input, shape index: {}]   ;;  %s1694_s3 = inlined_call_operand.vmem [shape: f32[32,64], index: 3, kind: input, shape index: {}]   ;;  %s1695_s4 = inlined_call_operand.vmem [shape: f32[32,32], index: 4, kind: input, shape index: {}]   ;;  %s1696_s5 = inlined_call_operand.vmem [shape: f32[1,32], index: 5, kind: input, shape index: {}]   ;;  %s1697_s6 = inlined_call_operand.vmem [shape: f32[1,32], index: 6, kind: input, shape index: {}]   ;;  %s1698_s7 = inlined_call_operand.vmem [shape: f32[16,32], index: 7, kind: output, shape index: {}]  }
   0x1 LB: > { %s1308_s25 = sadd.s32 4294967295, %s1483_s24   ;;  %p1312_p0 = scmp.ge.s32.totalorder %s1483_s24, 1  ;;  %s1483_s24 = sphi %s1537_s24, %s17_s24  }
   0x2   : > { %p245_p1 = scmp.lt.s32.totalorder %s1483_s24, 3 }
   0x4   : > { %p246_p2 = pnand %p1312_p0, %p245_p1 }
   0x5   : > { %p279_p3 = scmp.lt.s32.totalorder (!%p246_p2), %s1308_s25, 1  ;;  %s1487_s27 = smov (!%p246_p2), 112  }
   0x6   : > { %249 = sbr.rel (%p246_p2) target bundleno = 1674 (0x68a), region = 48  ;;  %s1488_s28 = smov (!%p246_p2), 120  }
   0x7   : > { %s1489_s29 = smov (!%p246_p2), 104   ;;  %s1490_s30 = smov (!%p246_p2), 96  }
   0x8   : > { %s1491_s8 = smov (!%p246_p2), 80   ;;  %s1492_s9 = smov (!%p246_p2), 72  }
   0x9   : > { %s1493_s10 = smov (!%p246_p2), 88   ;;  %s1495_s21 = smov (!%p246_p2), 16  }
   0xa   : > { %s1496_s22 = smov (!%p246_p2), 24  }
   0xb   : > { %v374_v0 = vld [vmem:[%s1694_s3 + $0x18] sm:$0xff]  ;;  %v1485_v2 = vmov 0.0   ;;  %v373_v3 = vld [vmem:[%s1694_s3 + $0x10] sm:$0xff]  ;;  %s1700_s25 = smov (!%p279_p3, %s1308_s25), 1  ;;  %v372_v5 = vld [vmem:[%s1694_s3 + $0x8] sm:$0xff]  ;;  %vm297_vm0 = vcmask 261120  }
   0xc   : > { %v296_v1 = vld [vmem:[%s1693_s2 + $0x18] sm:$0xff]  ;;  %1377 = vmatprep.subr.mxu1 %v1485_v2  ;;  %1366 = vmatprep.subr.mxu0 %v1485_v2  ;;  %v295_v4 = vld [vmem:[%s1693_s2 + $0x10] sm:$0xff]  ;;  %v294_v6 = vld [vmem:[%s1693_s2 + $0x8] sm:$0xff]  ;;  %s1567_s15 = sshll.u32 %s1700_s25, 3  ;;  %vm1486_vm1 = vmmov 0   ;;  %vm448_vm2 = vcmask 64512  }
   0xd   : > { %1378 = vmatpush3.msra.mxu1 %v374_v0  ;;  %1367 = vmatpush3.msra.mxu0 %v296_v1  ;;  %v371_v7 = vld [vmem:[%s1694_s3] sm:$0xff]  ;;  %s286_s20 = scalar_lea.vmem %s1692_s1, %s1567_s15  ;;  %s282_s26 = scalar_lea.vmem %s1691_s0, %s1567_s15  ;;  %vm968_vm3 = vcmask 130112   ;;  %vm1050_vm4 = vcmask 195712   ;;  %vm1132_vm5 = vcmask 261312  }
   0xe   : > { %1379 = vmatprep.subr.mxu1 %v1485_v2  ;;  %1368 = vmatprep.subr.mxu0 %v1485_v2  ;;  %v292_v8 = vld [vmem:[%s286_s20] sm:$0xff]  ;;  %s1494_s20 = smov 8  }
   0xf   : > { %1380 = vmatpush3.msra.mxu1 %v373_v3  ;;  %1369 = vmatpush3.msra.mxu0 %v295_v4  ;;  %v293_v9 = vld [vmem:[%s1693_s2] sm:$0xff] }
  0x10   : > { %1381 = vmatprep.subr.mxu1 %v1485_v2  ;;  %1370 = vmatprep.subr.mxu0 %v1485_v2  ;;  %v1589_v10 = vld [vmem:[%s282_s26] sm:$0xff] }
  0x11   : > { %1382 = vmatpush3.msra.mxu1 %v372_v5  ;;  %1371 = vmatpush3.msra.mxu0 %v294_v6 }
  0x12   : > { %1383 = vmatprep.subr.mxu1 %v1485_v2  ;;  %1385 = vmatprep.mubr.msk.f32.mxu1 %vm1486_vm1, %v1485_v2 }
  0x13   : > { %1384 = vmatpush3.msra.mxu1 %v371_v7  ;;  %1372 = vmatprep.subr.mxu0 %v1485_v2 }
  0x14   : > { %1386 = vmatmul.mubr.msk.f32.vlgmr.msra.gmra.mxu1 %vm297_vm0, %v292_v8  ;;  %1373 = vmatpush3.msra.mxu0 %v293_v9 }
  0x15   : > { %1374 = vmatprep.mubr.msk.f32.mxu0 %vm1486_vm1, %v1485_v2  ;;  %1388 = vmatprep.subr.mxu1 %v1485_v2 }
  0x16   : > { %1375 = vmatmul.mubr.msk.f32.vlgmr.msra.gmra.mxu0 %vm297_vm0, %v1589_v10  ;;  %1390 = vmatprep.mubr.msk.f32.mxu1 %vm1486_vm1, %v1485_v2 }
  0x17   : > { %1398 = vmatprep.subr.mxu0 %v1485_v2  ;;  %1400 = vmatprep.mubr.msk.f32.mxu0 %vm1486_vm1, %v1485_v2 }
  0xd4   : > { %v1602_v11 = vpop.f32.mrf.mxu1 }
  0xd5   : > { %607 = vrot.lane.b32.xlu1 %v1602_v11, %s1487_s27  ;;  %528 = vrot.lane.b32.xlu0 %v1602_v11, %s1488_s28 }
  0xd6   : > { %1389 = vmatpush3.xpose.msk.msra.mxu1 %vm448_vm2, %v1602_v11  ;;  %v367_v12 = vpop.f32.mrf.mxu0  ;;  %v1387_v13 = vpop.f32.mrf.mxu1 }
  0xd7   : > { %1393 = vmatprep.subr.mxu1 %v1485_v2  ;;  %v1138_v13 = vld [vmem:[%s1695_s4 + $0x18] sm:$0xff] }
  0xd8   : > { %v1376_v14 = vpop.f32.mrf.mxu0 }
  0xd9   : > { %1391 = vmatmul.mubr.msk.f32.vlgmr.msra.gmra.mxu1 %vm448_vm2, %v367_v12  ;;  %686 = vrot.lane.b32.xlu1 %v1602_v11, %s1489_s29  ;;  %v1137_v14 = vld [vmem:[%s1695_s4 + $0x10] sm:$0xff] }
  0xda   : > { %526 = vrot.lane.b32.xlu0 %v367_v12, %s1488_s28  ;;  %1395 = vmatprep.mubr.msk.f32.mxu1 %vm1486_vm1, %v1485_v2 }
  0xdd   : > { %684 = vrot.lane.b32.xlu1 %v367_v12, %s1489_s29 }
  0xde   : > { %605 = vrot.lane.b32.xlu0 %v367_v12, %s1487_s27 }
 0x147   : > { %v608_v15 = vpop.permute.xlu1 %607  ;;  %v529_v16 = vpop.permute.xlu0 %528 }
 0x148   : > { %1394 = vmatpush3.xpose.msk.msra.mxu1 %vm448_vm2, %v529_v16  ;;  %1399 = vmatpush3.xpose.msk.msra.mxu0 %vm448_vm2, %v608_v15  ;;  %v1136_v15 = vld [vmem:[%s1695_s4 + $0x8] sm:$0xff] }
 0x149   : > { %1403 = vmatprep.subr.mxu1 %v1485_v2  ;;  %1408 = vmatprep.subr.mxu0 %v1485_v2 }
 0x14b   : > { %v687_v17 = vpop.permute.xlu1 %686 }
 0x14c   : > { %v527_v18 = vpop.permute.xlu0 %526 }
 0x14d   : > { %1396 = vmatmul.mubr.msk.f32.vlgmr.msra.gmra.mxu1 %vm448_vm2, %v527_v18 }
 0x14e   : > { %1404 = vmatpush3.xpose.msk.msra.mxu1 %vm448_vm2, %v687_v17  ;;  %1405 = vmatprep.mubr.msk.f32.mxu1 %vm1486_vm1, %v1485_v2  ;;  %v1135_v17 = vld [vmem:[%s1695_s4] sm:$0xff] }
 0x14f   : > { %v685_v19 = vpop.permute.xlu1 %684  ;;  %1413 = vmatprep.subr.mxu1 %v1485_v2 }
 0x150   : > { %v606_v20 = vpop.permute.xlu0 %605 }
 0x151   : > { %1401 = vmatmul.mubr.msk.f32.vlgmr.msra.gmra.mxu0 %vm448_vm2, %v606_v20  ;;  %1406 = vmatmul.mubr.msk.f32.vlgmr.msra.gmra.mxu1 %vm448_vm2, %v685_v19 }
 0x152   : > { %1410 = vmatprep.mubr.msk.f32.mxu0 %vm1486_vm1, %v1485_v2  ;;  %1415 = vmatprep.mubr.msk.f32.mxu1 %vm1486_vm1, %v1485_v2 }
 0x199   : > { %v521_v21 = vpop.f32.mrf.mxu1 }
 0x19a   : > { %525 = vst.msk [vmem:[#allocation2] sm:$0xff] %vm448_vm2, %v521_v21 }
 0x19b   : > { %v1392_v22 = vpop.f32.mrf.mxu1 }
 0x1a1   : > { %v763_v23 = vld [vmem:[#allocation2] sm:$0xff] }
 0x1a2   : > { %v767_v24 = vsel %vm448_vm2, %v763_v23, -inf }
 0x1a3   : > { %768 = vmax.xlane.f32.xlu0 %v767_v24 }
 0x20d   : > { %v600_v25 = vpop.f32.mrf.mxu1 }
 0x20e   : > { %604 = vst.msk [vmem:[#allocation2 + $0x8] sm:$0xff] %vm448_vm2, %v600_v25 }
 0x20f   : > { %v1397_v26 = vpop.f32.mrf.mxu1 }
 0x211   : > { %v679_v27 = vpop.f32.mrf.mxu0  ;;  %v758_v28 = vpop.f32.mrf.mxu1 }
 0x212   : > { %683 = vst.msk [vmem:[#allocation2 + $0x10] sm:$0xff] %vm448_vm2, %v679_v27  ;;  %762 = vst.msk [vmem:[#allocation2 + $0x18] sm:$0xff] %vm448_vm2, %v758_v28 }
 0x213   : > { %v1402_v29 = vpop.f32.mrf.mxu0  ;;  %v1407_v30 = vpop.f32.mrf.mxu1 }
 0x215   : > { %v764_v31 = vld [vmem:[#allocation2 + $0x8] sm:$0xff] }
 0x216   : > { %v770_v32 = vsel %vm448_vm2, %v764_v31, -inf }
 0x217   : > { %771 = vmax.xlane.f32.xlu1 %v770_v32 }
 0x219   : > { %v765_v33 = vld [vmem:[#allocation2 + $0x10] sm:$0xff]  ;;  %v766_v35 = vld [vmem:[#allocation2 + $0x18] sm:$0xff] }
 0x21a   : > { %v773_v34 = vsel %vm448_vm2, %v765_v33, -inf  ;;  %v776_v36 = vsel %vm448_vm2, %v766_v35, -inf }
 0x21b   : > { %774 = vmax.xlane.f32.xlu0 %v773_v34 }
 0x21f   : > { %777 = vmax.xlane.f32.xlu0 %v776_v36 }
 0x228   : > { %811 = vrot.lane.b32.xlu1 %v1602_v11, %s1490_s30  ;;  %s290_s30 = scalar_lea.vmem %s1698_s7, %s1567_s15 }
 0x22c   : > { %v769_v37 = vpop.xlane.xlu0 %768 }
 0x22d   : > { %v779_v38 = vsub.f32 %v763_v23, %v769_v37 }
 0x22f   : > { %v783_v39 = vmul.f32 1.442695, %v779_v38 }
 0x231   : > { %1459 = vpow2.f32 %v783_v39 }
 0x23e   : > { %v1460_v40 = vpop.eup %1459 }
 0x23f   : > { %v791_v41 = vsel %vm448_vm2, %v1460_v40, 0.0 }
 0x24c   : > { %792 = vadd.xlane.f32.xlu1 %v791_v41 }
 0x2a0   : > { %v772_v42 = vpop.xlane.xlu1 %771 }
 0x2a1   : > { %v780_v43 = vsub.f32 %v764_v31, %v772_v42 }
 0x2a3   : > { %v785_v44 = vmul.f32 1.442695, %v780_v43 }
 0x2a4   : > { %v812_v45 = vpop.permute.xlu1 %811  ;;  %v775_v46 = vpop.xlane.xlu0 %774 }
 0x2a5   : > { %1461 = vpow2.f32 %v785_v44  ;;  %v781_v47 = vsub.f32 %v765_v33, %v775_v46  ;;  %1409 = vmatpush3.msra.mxu0 %v812_v45 }
 0x2a6   : > { %1418 = vmatprep.subr.mxu0 %v1485_v2 }
 0x2a7   : > { %v787_v48 = vmul.f32 1.442695, %v781_v47 }
 0x2a8   : > { %v778_v49 = vpop.xlane.xlu0 %777 }
 0x2a9   : > { %1463 = vpow2.f32 %v787_v48  ;;  %v782_v50 = vsub.f32 %v766_v35, %v778_v49 }
 0x2ab   : > { %v789_v51 = vmul.f32 1.442695, %v782_v50 }
 0x2ad   : > { %1465 = vpow2.f32 %v789_v51 }
 0x2b2   : > { %v1462_v52 = vpop.eup %1461 }
 0x2b3   : > { %v794_v53 = vsel %vm448_vm2, %v1462_v52, 0.0 }
 0x2b4   : > { %795 = vadd.xlane.f32.xlu0 %v794_v53 }
 0x2b6   : > { %v1464_v54 = vpop.eup %1463 }
 0x2b7   : > { %v797_v55 = vsel %vm448_vm2, %v1464_v54, 0.0 }
 0x2b8   : > { %798 = vadd.xlane.f32.xlu1 %v797_v55 }
 0x2ba   : > { %v1466_v56 = vpop.eup %1465 }
 0x2bb   : > { %v800_v57 = vsel %vm448_vm2, %v1466_v56, 0.0 }
 0x2bc   : > { %801 = vadd.xlane.f32.xlu0 %v800_v57 }
 0x2c9   : > { %970 = vrot.lane.b32.xlu1 %v1602_v11, %s1491_s8 }
 0x2cd   : > { %1052 = vrot.lane.b32.xlu1 %v1602_v11, %s1492_s9 }
 0x2d2   : > { %888 = vrot.lane.b32.xlu0 %v1602_v11, %s1493_s10 }
 0x2d5   : > { %v793_v58 = vpop.xlane.xlu1 %792 }
 0x2d6   : > { %1467 = vrcp.f32 %v793_v58 }
 0x2e3   : > { %v1468_v59 = vpop.eup %1467 }
 0x2e4   : > { %v807_v60 = vmul.f32 %v1468_v59, %v1460_v40  ;;  %v1332_v40 = vld [vmem:[%s1697_s6] ss:$0 sm:$0xff] }
 0x2e6   : > { %1411 = vmatmul.mubr.msk.f32.vlgmr.msra.gmra.mxu0 %vm448_vm2, %v807_v60 }
 0x2e7   : > { %1420 = vmatprep.mubr.msk.f32.mxu0 %vm1486_vm1, %v1485_v2 }
 0x33d   : > { %v796_v61 = vpop.xlane.xlu0 %795 }
 0x33e   : > { %1469 = vrcp.f32 %v796_v61 }
 0x341   : > { %v799_v62 = vpop.xlane.xlu1 %798 }
 0x342   : > { %1471 = vrcp.f32 %v799_v62 }
 0x345   : > { %v971_v63 = vpop.permute.xlu1 %970  ;;  %v802_v0 = vpop.xlane.xlu0 %801 }
 0x346   : > { %1473 = vrcp.f32 %v802_v0  ;;  %1419 = vmatpush3.msra.mxu0 %v971_v63 }
 0x347   : > { %1428 = vmatprep.subr.mxu0 %v1485_v2 }
 0x349   : > { %v889_v1 = vpop.permute.xlu0 %888  ;;  %v1053_v5 = vpop.permute.xlu1 %1052 }
 0x34a   : > { %1414 = vmatpush3.msra.mxu1 %v889_v1 }
 0x34b   : > { %v1470_v3 = vpop.eup %1469  ;;  %1423 = vmatprep.subr.mxu1 %v1485_v2 }
 0x34c   : > { %v808_v4 = vmul.f32 %v1470_v3, %v1462_v52 }
 0x34e   : > { %1416 = vmatmul.mubr.msk.f32.vlgmr.msra.gmra.mxu1 %vm448_vm2, %v808_v4 }
 0x34f   : > { %v1472_v6 = vpop.eup %1471  ;;  %1424 = vmatpush3.msra.mxu1 %v1053_v5  ;;  %1425 = vmatprep.mubr.msk.f32.mxu1 %vm1486_vm1, %v1485_v2 }
 0x350   : > { %v809_v7 = vmul.f32 %v1472_v6, %v1464_v54 }
 0x352   : > { %1421 = vmatmul.mubr.msk.f32.vlgmr.msra.gmra.mxu0 %vm448_vm2, %v809_v7 }
 0x353   : > { %v1474_v8 = vpop.eup %1473  ;;  %1436 = vmatprep.mubr.msk.f32.mxu0 %vm1486_vm1, %v1485_v2  ;;  %1429 = vmatpush3.msra.mxu0 %v1138_v13 }
 0x354   : > { %v810_v9 = vmul.f32 %v1474_v8, %v1466_v56  ;;  %1430 = vmatprep.subr.mxu0 %v1485_v2 }
 0x355   : > { %1431 = vmatpush3.msra.mxu0 %v1137_v14 }
 0x356   : > { %1426 = vmatmul.mubr.msk.f32.vlgmr.msra.gmra.mxu1 %vm448_vm2, %v810_v9  ;;  %1432 = vmatprep.subr.mxu0 %v1485_v2 }
 0x357   : > { %1433 = vmatpush3.msra.mxu0 %v1136_v15 }
 0x358   : > { %1434 = vmatprep.subr.mxu0 %v1485_v2 }
 0x359   : > { %1435 = vmatpush3.msra.mxu0 %v1135_v17 }
 0x3a6   : > { %v883_v11 = vpop.f32.mrf.mxu0 }
 0x3a7   : > { %887 = vst.msk [vmem:[#allocation3] sm:$0xff] %vm448_vm2, %v883_v11 }
 0x3a8   : > { %v1412_v12 = vpop.f32.mrf.mxu0 }
 0x40e   : > { %v960_v16 = vpop.f32.mrf.mxu1 }
 0x40f   : > { %965 = vrot.lane.b32.xlu0 %v960_v16, %s1494_s20 }
 0x410   : > { %v1417_v18 = vpop.f32.mrf.mxu1 }
 0x412   : > { %v1042_v19 = vpop.f32.mrf.mxu0 }
 0x413   : > { %1047 = vrot.lane.b32.xlu1 %v1042_v19, %s1495_s21 }
 0x414   : > { %v1422_v20 = vpop.f32.mrf.mxu0 }
 0x416   : > { %v1124_v21 = vpop.f32.mrf.mxu1 }
 0x417   : > { %1129 = vrot.lane.b32.xlu0 %v1124_v21, %s1496_s22 }
 0x418   : > { %v1427_v22 = vpop.f32.mrf.mxu1 }
 0x481   : > { %v966_v23 = vpop.permute.xlu0 %965 }
 0x482   : > { %969 = vst.msk [vmem:[#allocation3] sm:$0xff] %vm968_vm3, %v966_v23 }
 0x485   : > { %v1048_v24 = vpop.permute.xlu1 %1047 }
 0x486   : > { %1051 = vst.msk [vmem:[#allocation3] sm:$0xff] %vm1050_vm4, %v1048_v24 }
 0x489   : > { %v1130_v25 = vpop.permute.xlu0 %1129 }
 0x48a   : > { %1133 = vst.msk [vmem:[#allocation3] sm:$0xff] %vm1132_vm5, %v1130_v25 }
 0x491   : > { %v1134_v26 = vld [vmem:[#allocation3] sm:$0xff] }
 0x492   : > { %1437 = vmatmul.mubr.msk.f32.vlgmr.msra.gmra.mxu0 %vm297_vm0, %v1134_v26 }
 0x552   : > { %v1208_v2 = vpop.f32.mrf.mxu0 }
 0x553   : > { %v1209_v27 = vadd.f32 %v1208_v2, %v1589_v10  ;;  %v1331_v10 = vld [vmem:[%s1696_s5] ss:$0 sm:$0xff] }
 0x554   : > { %v1438_v28 = vpop.f32.mrf.mxu0 }
 0x555   : > { %v1214_v29 = vsel %vm297_vm0, %v1209_v27, 0.0 }
 0x556   : > { %1215 = vadd.xlane.f32.xlu1 %v1214_v29 }
 0x5df   : > { %v1216_v30 = vpop.xlane.xlu1 %1215 }
 0x5e0   : > { %v1218_v31 = vmul.f32 0.03125, %v1216_v30 }
 0x5e2   : > { %v1219_v32 = vsub.f32 %v1209_v27, %v1218_v31 }
 0x5e4   : > { %v1220_v33 = vmul.f32 %v1219_v32, %v1219_v32 }
 0x5e6   : > { %v1221_v34 = vsel %vm297_vm0, %v1220_v33, 0.0 }
 0x5e7   : > { %1222 = vadd.xlane.f32.xlu0 %v1221_v34 }
 0x670   : > { %v1223_v35 = vpop.xlane.xlu0 %1222 }
 0x671   : > { %v1224_v36 = vmul.f32 0.03125, %v1223_v35 }
 0x673   : > { %v1225_v37 = vadd.f32 1e-06, %v1224_v36 }
 0x675   : > { %1475 = vrsqrt.f32 %v1225_v37 }
 0x682   : > { %v1476_v38 = vpop.eup %1475 }
 0x683   : > { %v1227_v39 = vmul.f32 %v1476_v38, %v1219_v32 }
 0x685   : > { %v1234_v41 = vmul.f32 %v1331_v10, %v1227_v39 }
 0x687   : > { %v1241_v42 = vadd.f32 %v1332_v40, %v1234_v41 }
 0x689   : > { %1242 = vst.msk [vmem:[%s290_s30] sm:$0xff] %vm297_vm0, %v1241_v42 }
 0x68a PF: > { %s17_s24 = sadd.s32 1, %s1483_s24  }
 0x68b   : > { %p14_p4 = scmp.ge.s32.totalorder %s17_s24, 4  }
 0x68d   :  { %16 = sbr.rel (!%p14_p4) target bundleno = 1 (0x1), region = 81 }

// kernel: _lambda_.7
= control target key start
LH: loop header
LB: loop body
LE: loop exit
PB: predicated region body
PF: predicated region fallthrough
CT: control target
= control target key end

     0   :  { %s688_s24 = smov 0   ;;  %s768_s0 = inlined_call_operand.vmem [shape: f32[16,32], index: 0, kind: input, shape index: {}]   ;;  %s769_s1 = inlined_call_operand.vmem [shape: f32[32,64], index: 1, kind: input, shape index: {}]   ;;  %s770_s2 = inlined_call_operand.vmem [shape: f32[1,64], index: 2, kind: input, shape index: {}]   ;;  %s771_s3 = inlined_call_operand.vmem [shape: f32[64,32], index: 3, kind: input, shape index: {}]   ;;  %s772_s4 = inlined_call_operand.vmem [shape: f32[1,32], index: 4, kind: input, shape index: {}]   ;;  %s773_s5 = inlined_call_operand.vmem [shape: f32[1,32], index: 5, kind: input, shape index: {}]   ;;  %s774_s6 = inlined_call_operand.vmem [shape: f32[1,32], index: 6, kind: input, shape index: {}]   ;;  %s775_s7 = inlined_call_operand.vmem [shape: f32[16,32], index: 7, kind: output, shape index: {}]  }
   0x1 LB: > { %s564_s25 = sadd.s32 4294967295, %s644_s24   ;;  %p568_p0 = scmp.ge.s32.totalorder %s644_s24, 1  ;;  %s644_s24 = sphi %s688_s24, %s17_s24  }
   0x2   : > { %p236_p1 = scmp.lt.s32.totalorder %s644_s24, 3 }
   0x4   : > { %p237_p2 = pnand %p568_p0, %p236_p1 }
   0x5   : > { %p266_p3 = scmp.lt.s32.totalorder (!%p237_p2), %s564_s25, 1 }
   0x6   : > { %240 = sbr.rel (%p237_p2) target bundleno = 763 (0x2fb), region = 48 }
   0xb   : > { %v278_v0 = vld [vmem:[%s769_s1 + $0x18] sm:$0xff]  ;;  %v646_v1 = vmov 0.0   ;;  %v277_v2 = vld [vmem:[%s769_s1 + $0x10] sm:$0xff]  ;;  %vm647_vm0 = vmmov 0   ;;  %s777_s25 = smov (!%p266_p3, %s564_s25), 1  ;;  %v276_v3 = vld [vmem:[%s769_s1 + $0x8] sm:$0xff] }
   0xc   : > { %594 = vmatprep.subr.mxu0 %v646_v1  ;;  %602 = vmatprep.mubr.msk.f32.mxu0 %vm647_vm0, %v646_v1  ;;  %s569_s9 = sshll.u32 %s777_s25, 3  ;;  %v275_v4 = vld [vmem:[%s769_s1] sm:$0xff]  ;;  %vm286_vm1 = vcmask 261120   ;;  %v397_v6 = vld [vmem:[%s771_s3 + $0x38] sm:$0xff]  ;;  %v396_v7 = vld [vmem:[%s771_s3 + $0x30] sm:$0xff]  ;;  %vm405_vm2 = vcmask 523264  }
   0xd   : > { %595 = vmatpush3.msra.mxu0 %v278_v0  ;;  %605 = vmatprep.subr.mxu1 %v646_v1  ;;  %s269_s14 = scalar_lea.vmem %s768_s0, %s569_s9  ;;  %v395_v8 = vld [vmem:[%s771_s3 + $0x28] sm:$0xff]  ;;  %v394_v9 = vld [vmem:[%s771_s3 + $0x20] sm:$0xff]  ;;  %v393_v10 = vld [vmem:[%s771_s3 + $0x18] sm:$0xff]  ;;  %s273_s21 = scalar_lea.vmem %s775_s7, %s569_s9 }
   0xe   : > { %596 = vmatprep.subr.mxu0 %v646_v1  ;;  %621 = vmatprep.mubr.msk.f32.mxu1 %vm647_vm0, %v646_v1  ;;  %v716_v5 = vld [vmem:[%s269_s14] sm:$0xff]  ;;  %v392_v11 = vld [vmem:[%s771_s3 + $0x10] sm:$0xff]  ;;  %v391_v12 = vld [vmem:[%s771_s3 + $0x8] sm:$0xff] }
   0xf   : > { %597 = vmatpush3.msra.mxu0 %v277_v2  ;;  %606 = vmatpush3.msra.mxu1 %v397_v6  ;;  %v390_v13 = vld [vmem:[%s771_s3] sm:$0xff] }
  0x10   : > { %598 = vmatprep.subr.mxu0 %v646_v1  ;;  %607 = vmatprep.subr.mxu1 %v646_v1  ;;  %v571_v14 = vld [vmem:[%s770_s2] ss:$0 sm:$0xff] }
  0x11   : > { %599 = vmatpush3.msra.mxu0 %v276_v3  ;;  %608 = vmatpush3.msra.mxu1 %v396_v7  ;;  %v574_v47 = vld [vmem:[%s772_s4] ss:$0 sm:$0xff] }
  0x12   : > { %600 = vmatprep.subr.mxu0 %v646_v1  ;;  %609 = vmatprep.subr.mxu1 %v646_v1  ;;  %v576_v62 = vld [vmem:[%s773_s5] ss:$0 sm:$0xff] }
  0x13   : > { %601 = vmatpush3.msra.mxu0 %v275_v4  ;;  %610 = vmatpush3.msra.mxu1 %v395_v8  ;;  %v577_v0 = vld [vmem:[%s774_s6] ss:$0 sm:$0xff] }
  0x14   : > { %603 = vmatmul.mubr.msk.f32.vlgmr.msra.gmra.mxu0 %vm286_vm1, %v716_v5  ;;  %611 = vmatprep.subr.mxu1 %v646_v1 }
  0x15   : > { %612 = vmatpush3.msra.mxu1 %v394_v9 }
  0x16   : > { %613 = vmatprep.subr.mxu1 %v646_v1 }
  0x17   : > { %614 = vmatpush3.msra.mxu1 %v393_v10 }
  0x18   : > { %615 = vmatprep.subr.mxu1 %v646_v1 }
  0x19   : > { %616 = vmatpush3.msra.mxu1 %v392_v11 }
  0x1a   : > { %617 = vmatprep.subr.mxu1 %v646_v1 }
  0x1b   : > { %618 = vmatpush3.msra.mxu1 %v391_v12 }
  0x1c   : > { %619 = vmatprep.subr.mxu1 %v646_v1 }
  0x1d   : > { %620 = vmatpush3.msra.mxu1 %v390_v13 }
  0xd4   : > { %v356_v15 = vpop.f32.mrf.mxu0 }
  0xd5   : > { %v357_v16 = vadd.f32 %v571_v14, %v356_v15 }
  0xd6   : > { %v604_v17 = vpop.f32.mrf.mxu0 }
  0xd7   : > { %v361_v18 = vmul.f32 0.70710677, %v357_v16  ;;  %v360_v44 = vmul.f32 0.5, %v357_v16 }
  0xd9   : > { %v573_v19 = vclamps-f32 %v361_v18, 4.0 }
  0xdb   : > { %v364_v20 = vmul.f32 %v573_v19, %v573_v19 }
  0xdd   : > { %v365_v21 = vmul.f32 -2.7261424e-10, %v364_v20  ;;  %v377_v22 = vmul.f32 -1.45660715e-05, %v364_v20 }
  0xdf   : > { %v366_v23 = vadd.f32 2.7706815e-08, %v365_v21  ;;  %v378_v24 = vadd.f32 -0.00021337405, %v377_v22 }
  0xe1   : > { %v367_v25 = vmul.f32 %v366_v23, %v364_v20  ;;  %v379_v26 = vmul.f32 %v378_v24, %v364_v20 }
  0xe3   : > { %v368_v27 = vadd.f32 -2.101024e-06, %v367_v25  ;;  %v380_v28 = vadd.f32 -0.001682827, %v379_v26 }
  0xe5   : > { %v369_v29 = vmul.f32 %v368_v27, %v364_v20  ;;  %v381_v30 = vmul.f32 %v380_v28, %v364_v20 }
  0xe7   : > { %v370_v31 = vadd.f32 -5.6925062e-05, %v369_v29  ;;  %v382_v32 = vadd.f32 -0.0073733293, %v381_v30 }
  0xe9   : > { %v371_v33 = vmul.f32 %v370_v31, %v364_v20  ;;  %v383_v34 = vmul.f32 %v382_v32, %v364_v20 }
  0xeb   : > { %v372_v35 = vadd.f32 -0.00073499064, %v371_v33  ;;  %v384_v36 = vadd.f32 -0.014264739, %v383_v34 }
  0xed   : > { %v373_v37 = vmul.f32 %v372_v35, %v364_v20  ;;  %634 = vrcp.f32 %v384_v36 }
  0xef   : > { %v374_v38 = vadd.f32 -0.0029546, %v373_v37 }
  0xf1   : > { %v375_v39 = vmul.f32 %v374_v38, %v364_v20 }
  0xf3   : > { %v376_v40 = vadd.f32 -0.016096033, %v375_v39 }
  0xf5   : > { %v385_v41 = vmul.f32 %v573_v19, %v376_v40 }
  0xfa   : > { %v635_v42 = vpop.eup %634 }
  0xfb   : > { %v387_v43 = vmul.f32 %v635_v42, %v385_v41 }
  0xfd   : > { %v388_v45 = vadd.f32 1.0, %v387_v43 }
  0xff   : > { %v389_v46 = vmul.f32 %v388_v45, %v360_v44 }
 0x101   : > { %622 = vmatmul.mubr.msk.f32.vlgmr.msra.gmra.mxu1 %vm405_vm2, %v389_v46 }
 0x1c1   : > { %v475_v48 = vpop.f32.mrf.mxu1 }
 0x1c2   : > { %v476_v49 = vadd.f32 %v574_v47, %v475_v48 }
 0x1c3   : > { %v623_v50 = vpop.f32.mrf.mxu1 }
 0x1c4   : > { %v479_v51 = vadd.f32 %v476_v49, %v716_v5 }
 0x1c6   : > { %v482_v52 = vsel %vm286_vm1, %v479_v51, 0.0 }
 0x1c7   : > { %483 = vadd.xlane.f32.xlu0 %v482_v52 }
 0x250   : > { %v484_v53 = vpop.xlane.xlu0 %483 }
 0x251   : > { %v486_v54 = vmul.f32 0.03125, %v484_v53 }
 0x253   : > { %v487_v55 = vsub.f32 %v479_v51, %v486_v54 }
 0x255   : > { %v488_v56 = vmul.f32 %v487_v55, %v487_v55 }
 0x257   : > { %v489_v57 = vsel %vm286_vm1, %v488_v56, 0.0 }
 0x258   : > { %490 = vadd.xlane.f32.xlu0 %v489_v57 }
 0x2e1   : > { %v491_v58 = vpop.xlane.xlu0 %490 }
 0x2e2   : > { %v492_v59 = vmul.f32 0.03125, %v491_v58 }
 0x2e4   : > { %v493_v60 = vadd.f32 1e-06, %v492_v59 }
 0x2e6   : > { %636 = vrsqrt.f32 %v493_v60 }
 0x2f3   : > { %v637_v61 = vpop.eup %636 }
 0x2f4   : > { %v495_v63 = vmul.f32 %v637_v61, %v487_v55 }
 0x2f6   : > { %v502_v1 = vmul.f32 %v576_v62, %v495_v63 }
 0x2f8   : > { %v509_v2 = vadd.f32 %v577_v0, %v502_v1 }
 0x2fa   : > { %510 = vst.msk [vmem:[%s273_s21] sm:$0xff] %vm286_vm1, %v509_v2 }
 0x2fb PF: > { %s17_s24 = sadd.s32 1, %s644_s24  }
 0x2fc   : > { %p14_p4 = scmp.ge.s32.totalorder %s17_s24, 4  }
 0x2fe   :  { %16 = sbr.rel (!%p14_p4) target bundleno = 1 (0x1), region = 78 }

// kernel: _lambda_.9
= control target key start
LH: loop header
LB: loop body
LE: loop exit
PB: predicated region body
PF: predicated region fallthrough
CT: control target
= control target key end

     0   :  { %12 = vsyncpa [#allocation3], 0  ;;  %s938_s0 = inlined_call_operand.vmem [shape: f32[16,32], index: 0, kind: input, shape index: {}]   ;;  %s939_s1 = inlined_call_operand.vmem [shape: f32[32,64], index: 1, kind: input, shape index: {}]   ;;  %s940_s2 = inlined_call_operand.vmem [shape: f32[1,64], index: 2, kind: input, shape index: {}]   ;;  %s941_s3 = inlined_call_operand.vmem [shape: f32[64,32], index: 3, kind: input, shape index: {}]   ;;  %s942_s4 = inlined_call_operand.vmem [shape: f32[1,32], index: 4, kind: input, shape index: {}]   ;;  %s943_s5 = inlined_call_operand.vmem [shape: f32[1,32], index: 5, kind: input, shape index: {}]   ;;  %s944_s6 = inlined_call_operand.vmem [shape: f32[1,32], index: 6, kind: input, shape index: {}]   ;;  %s945_s7 = inlined_call_operand.hbm [shape: f32[16,32], index: 7, kind: output, shape index: {}]  }
   0x1   :  { %14 = vsyncpa [#allocation3 + $0x1], 0  ;;  %s795_s24 = smov 0   ;;  %s797_s25 = smov 0  }
   0x2   :  { %s799_s26 = smov 0   ;;  %s801_s27 = smov 0  }
   0x3 LB: > { %s816_s28 = sadd.s32 4294967295, %s750_s27   ;;  %s584_s29 = sadd.s32 4294967294, %s750_s27   ;;  %s750_s27 = sphi %s801_s27, %s951_s27   ;;  %s746_s26 = sphi %s799_s26, %s950_s26   ;;  %s742_s25 = sphi %s797_s25, %s949_s25   ;;  %s738_s24 = sphi %s795_s24, %s948_s24  }
   0x4   : > { %s820_s30 = sadd.s32 1, %s750_s27   ;;  %s179_s8 = sadd.s32 1, %s746_s26 }
   0x5   : > { %s176_s9 = ssub.s32 %s750_s27, %s820_s30  ;;  %p189_p0 = scmp.ne.s32.totalorder %s746_s26, %s742_s25 }
   0x6   : > { %p177_p1 = scmp.eq.s32.totalorder %s176_s9, 0  ;;  %p190_p2 = scmp.eq.s32.totalorder %s816_s28, 1 }
   0x7   : > { %p195_p3 = scmp.ne.s32.totalorder %s742_s25, %s738_s24  ;;  %p196_p4 = scmp.eq.s32.totalorder %s584_s29, 1 }
   0x8   : > { %s831_s10 = scalar_select %p177_p1, %s746_s26, %s179_s8  }
   0x9   : > { %p833_p5 = por %p190_p2, %p189_p0  ;;  %p837_p6 = por %p196_p4, %p195_p3 }
   0xa   : > { %p587_p7 = scmp.ge.s32.totalorder %s750_s27, 1  ;;  %p239_p8 = scmp.lt.s32.totalorder %s750_s27, 3 }
   0xc   : > { %p240_p9 = pnand %p587_p7, %p239_p8 }
   0xd   : > { %p270_p10 = scmp.lt.s32.totalorder (!%p240_p9), %s816_s28, 1  ;;  %s267_s18 = sand.u32 (!%p240_p9), 1, %s742_s25  }
   0xe   : > { %243 = sbr.rel (%p240_p9) target bundleno = 783 (0x30f), region = 48  ;;  %s588_s19 = sshll.u32 (!%p240_p9), %s267_s18, 3 }
   0xf   : > { %s598_s29 = sshll.u32 (!%p240_p9), %s816_s28, 7  ;;  %s512_s16 = scalar_lea.sflag (!%p240_p9), [#allocation3], %s267_s18 }
  0x10   : > { %s523_s15 = scalar_lea.hbm (!%p240_p9), %s945_s7, %s598_s29 }
  0x13   : > { %v278_v0 = vld [vmem:[%s939_s1 + $0x18] sm:$0xff]  ;;  %v752_v1 = vmov 0.0   ;;  %v277_v2 = vld [vmem:[%s939_s1 + $0x10] sm:$0xff]  ;;  %vm753_vm0 = vmmov 0   ;;  %s271_s17 = scalar_select %p270_p10, %s816_s28, 1  ;;  %v276_v3 = vld [vmem:[%s939_s1 + $0x8] sm:$0xff] }
  0x14   : > { %615 = vmatprep.subr.mxu0 %v752_v1  ;;  %623 = vmatprep.mubr.msk.f32.mxu0 %vm753_vm0, %v752_v1  ;;  %v275_v4 = vld [vmem:[%s939_s1] sm:$0xff]  ;;  %vm286_vm1 = vcmask 261120   ;;  %v397_v6 = vld [vmem:[%s941_s3 + $0x38] sm:$0xff]  ;;  %v396_v7 = vld [vmem:[%s941_s3 + $0x30] sm:$0xff]  ;;  %vm405_vm2 = vcmask 523264  }
  0x15   : > { %616 = vmatpush3.msra.mxu0 %v278_v0  ;;  %626 = vmatprep.subr.mxu1 %v752_v1  ;;  %s589_s20 = sshll.u32 %s271_s17, 3  ;;  %v395_v8 = vld [vmem:[%s941_s3 + $0x28] sm:$0xff]  ;;  %v394_v9 = vld [vmem:[%s941_s3 + $0x20] sm:$0xff]  ;;  %v393_v10 = vld [vmem:[%s941_s3 + $0x18] sm:$0xff] }
  0x16   : > { %617 = vmatprep.subr.mxu0 %v752_v1  ;;  %642 = vmatprep.mubr.msk.f32.mxu1 %vm753_vm0, %v752_v1  ;;  %s273_s8 = scalar_lea.vmem %s938_s0, %s589_s20  ;;  %v392_v11 = vld [vmem:[%s941_s3 + $0x10] sm:$0xff]  ;;  %v391_v12 = vld [vmem:[%s941_s3 + $0x8] sm:$0xff]  ;;  %v390_v13 = vld [vmem:[%s941_s3] sm:$0xff]  ;;  %s754_s20 = smov [#allocation2]  }
  0x17   : > { %618 = vmatpush3.msra.mxu0 %v277_v2  ;;  %v860_v5 = vld [vmem:[%s273_s8] sm:$0xff]  ;;  %627 = vmatpush3.msra.mxu1 %v397_v6  ;;  %s269_s8 = scalar_lea.vmem [#allocation2], %s588_s19  ;;  %s694_s21 = sshll.u32 %s754_s20, 4  ;;  %s695_s21 = int_to_ptr.vmem [resolvable:$false] %s694_s21 }
  0x18   : > { %619 = vmatprep.subr.mxu0 %v752_v1  ;;  %628 = vmatprep.subr.mxu1 %v752_v1  ;;  %v590_v14 = vld [vmem:[%s940_s2] ss:$0 sm:$0xff]  ;;  %s525_s9 = sshll.u32 %s269_s8, 4  ;;  %s696_s28 = scalar_lea.vmem %s695_s21, 256  ;;  %s526_s9 = int_to_ptr.vmem [resolvable:$true] %s525_s9 }
  0x19   : > { %620 = vmatpush3.msra.mxu0 %v276_v3  ;;  %629 = vmatpush3.msra.mxu1 %v396_v7  ;;  %v593_v47 = vld [vmem:[%s942_s4] ss:$0 sm:$0xff]  ;;  %s690_s17 = scalar_lea.vmem %s526_s9, 128  ;;  %p697_p0 = scmp.lt.s32.totalorder %s526_s9, %s695_s21 }
  0x1a   : > { %621 = vmatprep.subr.mxu0 %v752_v1  ;;  %630 = vmatprep.subr.mxu1 %v752_v1  ;;  %v595_v62 = vld [vmem:[%s943_s5] ss:$0 sm:$0xff]  ;;  %p691_p11 = scmp.ne.s32.totalorder %s526_s9, %s690_s17  ;;  %p698_p1 = scmp.lt.s32.totalorder %s696_s28, %s690_s17 }
  0x1b   : > { %622 = vmatpush3.msra.mxu0 %v275_v4  ;;  %631 = vmatpush3.msra.mxu1 %v395_v8  ;;  %v596_v0 = vld [vmem:[%s944_s6] ss:$0 sm:$0xff] }
  0x1c   : > { %624 = vmatmul.mubr.msk.f32.vlgmr.msra.gmra.mxu0 %vm286_vm1, %v860_v5  ;;  %632 = vmatprep.subr.mxu1 %v752_v1  ;;  %p692_p12 = pnand %p691_p11, %p833_p5  ;;  %p699_p2 = por %p698_p1, %p697_p0 }
  0x1d   : > { %633 = vmatpush3.msra.mxu1 %v394_v9 }
  0x1e   : > { %634 = vmatprep.subr.mxu1 %v752_v1  ;;  %p693_p13 = pneg %p692_p12 }
  0x1f   : > { %635 = vmatpush3.msra.mxu1 %v393_v10 }
  0x20   : > { %636 = vmatprep.subr.mxu1 %v752_v1  ;;  %p700_p3 = pnand %p699_p2, %p693_p13 }
  0x21   : > { %637 = vmatpush3.msra.mxu1 %v392_v11 }
  0x22   : > { %638 = vmatprep.subr.mxu1 %v752_v1 }
  0x23   : > { %639 = vmatpush3.msra.mxu1 %v391_v12 }
  0x24   : > { %640 = vmatprep.subr.mxu1 %v752_v1 }
  0x25   : > { %641 = vmatpush3.msra.mxu1 %v390_v13 }
  0xdc   : > { %v356_v15 = vpop.f32.mrf.mxu0 }
  0xdd   : > { %v357_v16 = vadd.f32 %v590_v14, %v356_v15 }
  0xde   : > { %v625_v17 = vpop.f32.mrf.mxu0 }
  0xdf   : > { %v361_v18 = vmul.f32 0.70710677, %v357_v16  ;;  %v360_v44 = vmul.f32 0.5, %v357_v16 }
  0xe1   : > { %v592_v19 = vclamps-f32 %v361_v18, 4.0 }
  0xe3   : > { %v364_v20 = vmul.f32 %v592_v19, %v592_v19 }
  0xe5   : > { %v365_v21 = vmul.f32 -2.7261424e-10, %v364_v20  ;;  %v377_v22 = vmul.f32 -1.45660715e-05, %v364_v20 }
  0xe7   : > { %v366_v23 = vadd.f32 2.7706815e-08, %v365_v21  ;;  %v378_v24 = vadd.f32 -0.00021337405, %v377_v22 }
  0xe9   : > { %v367_v25 = vmul.f32 %v366_v23, %v364_v20  ;;  %v379_v26 = vmul.f32 %v378_v24, %v364_v20 }
  0xeb   : > { %v368_v27 = vadd.f32 -2.101024e-06, %v367_v25  ;;  %v380_v28 = vadd.f32 -0.001682827, %v379_v26 }
  0xed   : > { %v369_v29 = vmul.f32 %v368_v27, %v364_v20  ;;  %v381_v30 = vmul.f32 %v380_v28, %v364_v20 }
  0xef   : > { %v370_v31 = vadd.f32 -5.6925062e-05, %v369_v29  ;;  %v382_v32 = vadd.f32 -0.0073733293, %v381_v30 }
  0xf1   : > { %v371_v33 = vmul.f32 %v370_v31, %v364_v20  ;;  %v383_v34 = vmul.f32 %v382_v32, %v364_v20 }
  0xf3   : > { %v372_v35 = vadd.f32 -0.00073499064, %v371_v33  ;;  %v384_v36 = vadd.f32 -0.014264739, %v383_v34 }
  0xf5   : > { %v373_v37 = vmul.f32 %v372_v35, %v364_v20  ;;  %686 = vrcp.f32 %v384_v36 }
  0xf7   : > { %v374_v38 = vadd.f32 -0.0029546, %v373_v37 }
  0xf9   : > { %v375_v39 = vmul.f32 %v374_v38, %v364_v20 }
  0xfb   : > { %v376_v40 = vadd.f32 -0.016096033, %v375_v39 }
  0xfd   : > { %v385_v41 = vmul.f32 %v592_v19, %v376_v40 }
 0x102   : > { %v687_v42 = vpop.eup %686 }
 0x103   : > { %v387_v43 = vmul.f32 %v687_v42, %v385_v41 }
 0x105   : > { %v388_v45 = vadd.f32 1.0, %v387_v43 }
 0x107   : > { %v389_v46 = vmul.f32 %v388_v45, %v360_v44 }
 0x109   : > { %643 = vmatmul.mubr.msk.f32.vlgmr.msra.gmra.mxu1 %vm405_vm2, %v389_v46 }
 0x1c9   : > { %v475_v48 = vpop.f32.mrf.mxu1 }
 0x1ca   : > { %v476_v49 = vadd.f32 %v593_v47, %v475_v48 }
 0x1cb   : > { %v644_v50 = vpop.f32.mrf.mxu1 }
 0x1cc   : > { %v479_v51 = vadd.f32 %v476_v49, %v860_v5 }
 0x1ce   : > { %v482_v52 = vsel %vm286_vm1, %v479_v51, 0.0 }
 0x1cf   : > { %483 = vadd.xlane.f32.xlu0 %v482_v52 }
 0x258   : > { %v484_v53 = vpop.xlane.xlu0 %483 }
 0x259   : > { %v486_v54 = vmul.f32 0.03125, %v484_v53 }
 0x25b   : > { %v487_v55 = vsub.f32 %v479_v51, %v486_v54 }
 0x25d   : > { %v488_v56 = vmul.f32 %v487_v55, %v487_v55 }
 0x25f   : > { %v489_v57 = vsel %vm286_vm1, %v488_v56, 0.0 }
 0x260   : > { %490 = vadd.xlane.f32.xlu0 %v489_v57 }
 0x2e9   : > { %v491_v58 = vpop.xlane.xlu0 %490 }
 0x2ea   : > { %v492_v59 = vmul.f32 0.03125, %v491_v58 }
 0x2ec   : > { %v493_v60 = vadd.f32 1e-06, %v492_v59 }
 0x2ee   : > { %688 = vrsqrt.f32 %v493_v60 }
 0x2fb   : > { %v689_v61 = vpop.eup %688 }
 0x2fc   : > { %v495_v63 = vmul.f32 %v689_v61, %v487_v55 }
 0x2fe   : > { %v502_v1 = vmul.f32 %v595_v62, %v495_v63 }
 0x300   : > { %v509_v2 = vadd.f32 %v596_v0, %v502_v1 }
 0x302   : > { %510 = vst.msk [vmem:[%s269_s8] sm:$0xff] %vm286_vm1, %v509_v2 }
 0x303   : > { %703 = shalt.err (!%p700_p3)
}
 0x304   : > { %s704_s19 = scalar_lea.hbm %s523_s15, 128  ;;  %s708_s23 = scalar_lea.hbm %s945_s7, 256 }
 0x305   : > { %p705_p4 = scmp.ne.s32.totalorder %s523_s15, %s704_s19  ;;  %p709_p9 = scmp.lt.s32.totalorder %s523_s15, %s945_s7 }
 0x306   : > { %p710_p10 = scmp.lt.s32.totalorder %s708_s23, %s704_s19 }
 0x307   : > { %p706_p7 = pnand %p705_p4, %p833_p5 }
 0x308   : > { %p711_p11 = por %p710_p10, %p709_p9 }
 0x309   : > { %p707_p8 = pneg %p706_p7 }
 0x30b   : > { %p712_p12 = pnand %p711_p11, %p707_p8 }
 0x30d   : > { %715 = shalt.err (!%p712_p12)
}
 0x30e   : > { %645 = dma.vmem_to_hbm [thread:$0]  (%p833_p5), %s526_s9, 128, %s523_s15, %s512_s16  }
 0x30f PF: > { %p651_p13 = scmp.ge.s32.totalorder %s750_s27, 2  ;;  %s537_s13 = sand.u32 1, %s738_s24  }
 0x310   : > { %s538_s14 = scalar_lea.sflag [#allocation3], %s537_s13 }
 0x311   : > { %p648_p0 = pnand %p651_p13, %p837_p6 }
 0x313   : > { %p649_p1 = pneg %p648_p0 }
 0x315   : > { %733 = dma.done.wait (%p649_p1), %s538_s14, 128  }
 0x316   : > { %735 = vsyncadd (%p649_p1), %s538_s14, 4294967168  ;;  %p17_p2 = scmp.ge.s32.totalorder %s820_s30, 4   ;;  %s948_s24 = smov %s742_s25 }
 0x317   : > { %s949_s25 = smov %s746_s26  ;;  %s950_s26 = smov %s831_s10 }
 0x318   : > { %s951_s27 = smov %s820_s30  ;;  %19 = sbr.rel (!%p17_p2) target bundleno = 3 (0x3), region = 83 }
 0x31d   :  { %543 = vsyncpa [#allocation3], 1 }
 0x31e   :  { %545 = vsyncpa [#allocation3 + $0x1], 1 }

// kernel: _lambda_.8
= control target key start
LH: loop header
LB: loop body
LE: loop exit
PB: predicated region body
PF: predicated region fallthrough
CT: control target
= control target key end

     0   :  { %s1650_s27 = smov 0   ;;  %s1839_s0 = inlined_call_operand.vmem [shape: f32[16,32], index: 0, kind: input, shape index: {}]   ;;  %s1840_s1 = inlined_call_operand.vmem [shape: f32[32,32], index: 1, kind: input, shape index: {}]   ;;  %s1841_s2 = inlined_call_operand.vmem [shape: f32[32,32], index: 2, kind: input, shape index: {}]   ;;  %s1842_s3 = inlined_call_operand.vmem [shape: f32[32,64], index: 3, kind: input, shape index: {}]   ;;  %s1843_s4 = inlined_call_operand.vmem [shape: f32[32,32], index: 4, kind: input, shape index: {}]   ;;  %s1844_s5 = inlined_call_operand.vmem [shape: f32[1,32], index: 5, kind: input, shape index: {}]   ;;  %s1845_s6 = inlined_call_operand.vmem [shape: f32[1,32], index: 6, kind: input, shape index: {}]   ;;  %s1846_s7 = inlined_call_operand.vmem [shape: f32[32,16], index: 7, kind: input, shape index: {}]   ;;  %s1847_s8 = inlined_call_operand.vmem [shape: f32[16,32], index: 8, kind: output, shape index: {}]  }
   0x1 LB: > { %s1385_s28 = sadd.s32 4294967295, %s1591_s27   ;;  %p1389_p0 = scmp.ge.s32.totalorder %s1591_s27, 1  ;;  %s1591_s27 = sphi %s1650_s27, %s18_s27  }
   0x2   : > { %p272_p1 = scmp.lt.s32.totalorder %s1591_s27, 3 }
   0x4   : > { %p273_p2 = pnand %p1389_p0, %p272_p1 }
   0x5   : > { %s1391_s11 = sshll.u32 (!%p273_p2), %s1385_s28, 1  ;;  %p309_p4 = scmp.lt.s32.totalorder (!%p273_p2), %s1385_s28, 1 }
   0x6   : > { %276 = sbr.rel (%p273_p2) target bundleno = 1679 (0x68f), region = 52  ;;  %p314_p3 = scmp.lt.s32.totalorder (!%p273_p2), %s1391_s11, 3 }
   0x7   : > { %s1595_s12 = smov (!%p273_p2), 112   ;;  %s1596_s13 = smov (!%p273_p2), 120  }
   0x8   : > { %s1597_s14 = smov (!%p273_p2), 104   ;;  %s1598_s23 = smov (!%p273_p2), 96  }
   0x9   : > { %s1599_s24 = smov (!%p273_p2), 88   ;;  %s1601_s26 = smov (!%p273_p2), 72  }
   0xa   : > { %s1603_s17 = smov (!%p273_p2), 16   ;;  %s1604_s18 = smov (!%p273_p2), 24  }
   0xb   : > { %v407_v0 = vld [vmem:[%s1842_s3 + $0x18] sm:$0xff]  ;;  %v406_v1 = vld [vmem:[%s1842_s3 + $0x10] sm:$0xff]  ;;  %v1593_v2 = vmov 0.0   ;;  %v405_v5 = vld [vmem:[%s1842_s3 + $0x8] sm:$0xff]  ;;  %s1849_s11 = smov (!%p314_p3, %s1391_s11), 3  ;;  %s1851_s28 = smov (!%p309_p4, %s1385_s28), 1 }
   0xc   : > { %1469 = vmatprep.subr.mxu1 %v407_v0  ;;  %1458 = vmatprep.subr.mxu0 %v1593_v2  ;;  %v329_v3 = vld [vmem:[%s1841_s2 + $0x18] sm:$0xff]  ;;  %v328_v4 = vld [vmem:[%s1841_s2 + $0x10] sm:$0xff]  ;;  %v327_v6 = vld [vmem:[%s1841_s2 + $0x8] sm:$0xff]  ;;  %s1392_s22 = sshll.u32 %s1849_s11, 3  ;;  %vm330_vm0 = vcmask 261120   ;;  %s1390_s30 = sshll.u32 %s1851_s28, 3 }
   0xd   : > { %1470 = vmatpush3.msra.mxu1 %v407_v0  ;;  %1459 = vmatpush3.msra.mxu0 %v329_v3  ;;  %v404_v7 = vld [vmem:[%s1842_s3] sm:$0xff]  ;;  %s317_s25 = scalar_lea.vmem %s1840_s1, %s1392_s22  ;;  %s312_s11 = scalar_lea.vmem %s1839_s0, %s1390_s30  ;;  %vm1594_vm1 = vmmov 0   ;;  %vm489_vm2 = vcmask 64512   ;;  %vm569_vm3 = vcmask 130048   ;;  %v825_v34 = vld [vmem:[%s1846_s7 + $0x8] sm:$0xff]  ;;  %v826_v41 = vld [vmem:[%s1846_s7 + $0x10] sm:$0xff] }
   0xe   : > { %1471 = vmatprep.subr.mxu1 %v406_v1  ;;  %1460 = vmatprep.subr.mxu0 %v1593_v2  ;;  %v326_v8 = vld [vmem:[%s1841_s2] sm:$0xff]  ;;  %v325_v10 = vld [vmem:[%s317_s25 + $0x8] sm:$0xff]  ;;  %v827_v44 = vld [vmem:[%s1846_s7 + $0x18] sm:$0xff]  ;;  %vm1039_vm4 = vcmask 130112   ;;  %vm1124_vm5 = vcmask 195712   ;;  %vm1209_vm6 = vcmask 261312  }
   0xf   : > { %1472 = vmatpush3.msra.mxu1 %v406_v1  ;;  %1461 = vmatpush3.msra.mxu0 %v328_v4  ;;  %v324_v9 = vld [vmem:[%s317_s25] sm:$0xff]  ;;  %s1600_s25 = smov 80  }
  0x10   : > { %1473 = vmatprep.subr.mxu1 %v405_v5  ;;  %1462 = vmatprep.subr.mxu0 %v1593_v2  ;;  %v1698_v11 = vld [vmem:[%s312_s11] sm:$0xff] }
  0x11   : > { %1474 = vmatpush3.msra.mxu1 %v405_v5  ;;  %1463 = vmatpush3.msra.mxu0 %v327_v6  ;;  %v824_v27 = vld [vmem:[%s1846_s7] sm:$0xff] }
  0x12   : > { %1475 = vmatprep.subr.mxu1 %v404_v7  ;;  %1464 = vmatprep.subr.mxu0 %v1593_v2 }
  0x13   : > { %1476 = vmatpush3.msra.mxu1 %v404_v7  ;;  %1477 = vmatprep.mubr.msk.f32.mxu1 %vm330_vm0, %v324_v9 }
  0x14   : > { %1478 = vmatmul.mubr.msk.f32.vlgmr.msra.gmra.mxu1 %vm330_vm0, %v325_v10  ;;  %1465 = vmatpush3.msra.mxu0 %v326_v8 }
  0x15   : > { %1466 = vmatprep.mubr.msk.f32.mxu0 %vm1594_vm1, %v1593_v2  ;;  %1480 = vmatprep.subr.mxu0 %v1593_v2 }
  0x16   : > { %1467 = vmatmul.mubr.msk.f32.vlgmr.msra.gmra.mxu0 %vm330_vm0, %v1698_v11  ;;  %1487 = vmatprep.subr.mxu1 %v1593_v2 }
  0x17   : > { %1484 = vmatprep.mubr.msk.f32.mxu0 %vm1594_vm1, %v1593_v2  ;;  %1491 = vmatprep.mubr.msk.f32.mxu1 %vm1594_vm1, %v1593_v2 }
  0xd4   : > { %v1711_v12 = vpop.f32.mrf.mxu1 }
  0xd5   : > { %658 = vrot.lane.b32.xlu1 %v1711_v12, %s1595_s12  ;;  %575 = vrot.lane.b32.xlu0 %v1711_v12, %s1596_s13 }
  0xd6   : > { %1481 = vmatpush3.xpose.msk.msra.mxu0 %vm489_vm2, %v1711_v12  ;;  %v400_v13 = vpop.f32.mrf.mxu0  ;;  %v1718_v14 = vpop.f32.mrf.mxu1 }
  0xd7   : > { %1482 = vmatprep.subr.mxu0 %v1593_v2 }
  0xd8   : > { %v1468_v15 = vpop.f32.mrf.mxu0 }
  0xd9   : > { %573 = vrot.lane.b32.xlu0 %v1718_v14, %s1596_s13  ;;  %571 = vrot.lane.b32.xlu1 %v400_v13, %s1596_s13 }
  0xda   : > { %1483 = vmatpush3.xpose.msk.msra.mxu0 %vm489_vm2, %v1718_v14 }
  0xdb   : > { %1494 = vmatprep.subr.mxu0 %v1593_v2 }
  0xdd   : > { %1485 = vmatmul.mubr.msk.f32.vlgmr.msra.gmra.mxu0 %vm489_vm2, %v400_v13  ;;  %741 = vrot.lane.b32.xlu0 %v1711_v12, %s1597_s14 }
  0xde   : > { %656 = vrot.lane.b32.xlu1 %v1718_v14, %s1595_s12  ;;  %1498 = vmatprep.mubr.msk.f32.mxu0 %vm1594_vm1, %v1593_v2 }
  0xe1   : > { %739 = vrot.lane.b32.xlu0 %v1718_v14, %s1597_s14 }
  0xe2   : > { %654 = vrot.lane.b32.xlu1 %v400_v13, %s1595_s12 }
  0xe5   : > { %737 = vrot.lane.b32.xlu0 %v400_v13, %s1597_s14  ;;  %s1602_s14 = smov 8  }
 0x147   : > { %v659_v16 = vpop.permute.xlu1 %658  ;;  %v576_v17 = vpop.permute.xlu0 %575 }
 0x148   : > { %1488 = vmatpush3.xpose.msk.msra.mxu1 %vm489_vm2, %v576_v17  ;;  %1495 = vmatpush3.xpose.msk.msra.mxu0 %vm489_vm2, %v659_v16 }
 0x149   : > { %1489 = vmatprep.subr.mxu1 %v1593_v2  ;;  %1496 = vmatprep.subr.mxu0 %v1593_v2 }
 0x14b   : > { %v574_v18 = vpop.permute.xlu0 %573  ;;  %v572_v19 = vpop.permute.xlu1 %571 }
 0x14c   : > { %1490 = vmatpush3.xpose.msk.msra.mxu1 %vm489_vm2, %v574_v18 }
 0x14d   : > { %1501 = vmatprep.subr.mxu1 %v1593_v2 }
 0x14f   : > { %v742_v20 = vpop.permute.xlu0 %741  ;;  %1492 = vmatmul.mubr.msk.f32.vlgmr.msra.gmra.mxu1 %vm489_vm2, %v572_v19 }
 0x150   : > { %v657_v21 = vpop.permute.xlu1 %656  ;;  %1502 = vmatpush3.xpose.msk.msra.mxu1 %vm489_vm2, %v742_v20  ;;  %1505 = vmatprep.mubr.msk.f32.mxu1 %vm1594_vm1, %v1593_v2 }
 0x151   : > { %1497 = vmatpush3.xpose.msk.msra.mxu0 %vm489_vm2, %v657_v21  ;;  %1503 = vmatprep.subr.mxu1 %v1593_v2 }
 0x152   : > { %1522 = vmatprep.subr.mxu0 %v1593_v2 }
 0x153   : > { %v740_v22 = vpop.permute.xlu0 %739 }
 0x154   : > { %v655_v23 = vpop.permute.xlu1 %654  ;;  %1504 = vmatpush3.xpose.msk.msra.mxu1 %vm489_vm2, %v740_v22 }
 0x155   : > { %1499 = vmatmul.mubr.msk.f32.vlgmr.msra.gmra.mxu0 %vm489_vm2, %v655_v23  ;;  %1508 = vmatprep.subr.mxu1 %v1593_v2 }
 0x156   : > { %1526 = vmatprep.mubr.msk.f32.mxu0 %vm1594_vm1, %v1593_v2 }
 0x157   : > { %v738_v24 = vpop.permute.xlu0 %737 }
 0x158   : > { %1506 = vmatmul.mubr.msk.f32.vlgmr.msra.gmra.mxu1 %vm489_vm2, %v738_v24 }
 0x159   : > { %1512 = vmatprep.mubr.msk.f32.mxu1 %vm1594_vm1, %v1593_v2 }
 0x19d   : > { %v565_v25 = vpop.f32.mrf.mxu0 }
 0x19e   : > { %570 = vst.msk [vmem:[#allocation2] sm:$0xff] %vm569_vm3, %v565_v25 }
 0x19f   : > { %v1486_v26 = vpop.f32.mrf.mxu0 }
 0x1a5   : > { %v820_v28 = vld [vmem:[#allocation2] sm:$0xff] }
 0x1a6   : > { %v828_v29 = vadd.f32 %v824_v27, %v820_v28 }
 0x1a8   : > { %v832_v30 = vsel %vm569_vm3, %v828_v29, -inf }
 0x1a9   : > { %833 = vmax.xlane.f32.xlu1 %v832_v30  ;;  %v1214_v30 = vld [vmem:[%s1843_s4 + $0x10] sm:$0xff] }
 0x20f   : > { %v649_v31 = vpop.f32.mrf.mxu1 }
 0x210   : > { %653 = vst.msk [vmem:[#allocation2 + $0x8] sm:$0xff] %vm569_vm3, %v649_v31  ;;  %v1213_v31 = vld [vmem:[%s1843_s4 + $0x8] sm:$0xff] }
 0x211   : > { %v1493_v32 = vpop.f32.mrf.mxu1 }
 0x215   : > { %v732_v33 = vpop.f32.mrf.mxu0 }
 0x216   : > { %736 = vst.msk [vmem:[#allocation2 + $0x10] sm:$0xff] %vm569_vm3, %v732_v33  ;;  %v1212_v33 = vld [vmem:[%s1843_s4] sm:$0xff] }
 0x217   : > { %v1500_v35 = vpop.f32.mrf.mxu0  ;;  %v821_v36 = vld [vmem:[#allocation2 + $0x8] sm:$0xff] }
 0x218   : > { %v815_v37 = vpop.f32.mrf.mxu1  ;;  %v829_v38 = vadd.f32 %v825_v34, %v821_v36 }
 0x219   : > { %819 = vst.msk [vmem:[#allocation2 + $0x18] sm:$0xff] %vm569_vm3, %v815_v37 }
 0x21a   : > { %v1507_v39 = vpop.f32.mrf.mxu1  ;;  %v835_v40 = vsel %vm569_vm3, %v829_v38, -inf }
 0x21b   : > { %836 = vmax.xlane.f32.xlu0 %v835_v40 }
 0x21d   : > { %v822_v42 = vld [vmem:[#allocation2 + $0x10] sm:$0xff] }
 0x21e   : > { %v830_v43 = vadd.f32 %v826_v41, %v822_v42 }
 0x220   : > { %v838_v45 = vsel %vm569_vm3, %v830_v43, -inf  ;;  %v823_v46 = vld [vmem:[#allocation2 + $0x18] sm:$0xff] }
 0x221   : > { %839 = vmax.xlane.f32.xlu0 %v838_v45  ;;  %v831_v47 = vadd.f32 %v827_v44, %v823_v46 }
 0x223   : > { %v841_v48 = vsel %vm569_vm3, %v831_v47, -inf }
 0x224   : > { %842 = vmax.xlane.f32.xlu1 %v841_v48 }
 0x232   : > { %v834_v49 = vpop.xlane.xlu1 %833 }
 0x233   : > { %v844_v50 = vsub.f32 %v828_v29, %v834_v49  ;;  %v1215_v29 = vld [vmem:[%s1843_s4 + $0x18] sm:$0xff] }
 0x235   : > { %876 = vrot.lane.b32.xlu1 %v1718_v14, %s1598_s23  ;;  %v848_v51 = vmul.f32 1.442695, %v844_v50 }
 0x237   : > { %878 = vrot.lane.b32.xlu0 %v1711_v12, %s1598_s23  ;;  %1567 = vpow2.f32 %v848_v51 }
 0x239   : > { %958 = vrot.lane.b32.xlu1 %v1711_v12, %s1599_s24 }
 0x23b   : > { %956 = vrot.lane.b32.xlu0 %v1718_v14, %s1599_s24 }
 0x23d   : > { %1043 = vrot.lane.b32.xlu1 %v1711_v12, %s1600_s25 }
 0x23f   : > { %1128 = vrot.lane.b32.xlu0 %v1711_v12, %s1601_s26 }
 0x244   : > { %v1568_v52 = vpop.eup %1567 }
 0x245   : > { %v856_v53 = vsel %vm569_vm3, %v1568_v52, 0.0 }
 0x25e   : > { %857 = vadd.xlane.f32.xlu0 %v856_v53 }
 0x2a4   : > { %v837_v54 = vpop.xlane.xlu0 %836 }
 0x2a5   : > { %v845_v55 = vsub.f32 %v829_v38, %v837_v54 }
 0x2a7   : > { %v850_v56 = vmul.f32 1.442695, %v845_v55 }
 0x2a9   : > { %1569 = vpow2.f32 %v850_v56  ;;  %v1415_v56 = vld [vmem:[%s1845_s6] ss:$0 sm:$0xff] }
 0x2aa   : > { %v840_v57 = vpop.xlane.xlu0 %839 }
 0x2ab   : > { %v846_v58 = vsub.f32 %v830_v43, %v840_v57 }
 0x2ad   : > { %v852_v59 = vmul.f32 1.442695, %v846_v58  ;;  %v843_v60 = vpop.xlane.xlu1 %842 }
 0x2ae   : > { %v847_v61 = vsub.f32 %v831_v47, %v843_v60  ;;  %v879_v62 = vpop.permute.xlu0 %878 }
 0x2af   : > { %1571 = vpow2.f32 %v852_v59  ;;  %1509 = vmatpush3.msra.mxu1 %v879_v62 }
 0x2b0   : > { %v854_v63 = vmul.f32 1.442695, %v847_v61  ;;  %1510 = vmatprep.subr.mxu1 %v1593_v2 }
 0x2b1   : > { %v877_v0 = vpop.permute.xlu1 %876 }
 0x2b2   : > { %1573 = vpow2.f32 %v854_v63  ;;  %1511 = vmatpush3.msra.mxu1 %v877_v0  ;;  %v957_v10 = vpop.permute.xlu0 %956 }
 0x2b3   : > { %1515 = vmatprep.subr.mxu1 %v1593_v2 }
 0x2b5   : > { %v959_v1 = vpop.permute.xlu1 %958 }
 0x2b6   : > { %v1570_v3 = vpop.eup %1569  ;;  %v1129_v12 = vpop.permute.xlu0 %1128 }
 0x2b7   : > { %v859_v4 = vsel %vm569_vm3, %v1570_v3, 0.0 }
 0x2b8   : > { %860 = vadd.xlane.f32.xlu1 %v859_v4 }
 0x2b9   : > { %v1044_v5 = vpop.permute.xlu1 %1043 }
 0x2ba   : > { %1523 = vmatpush3.msra.mxu0 %v1044_v5 }
 0x2bb   : > { %1524 = vmatprep.subr.mxu0 %v1593_v2 }
 0x2bc   : > { %v1572_v6 = vpop.eup %1571 }
 0x2bd   : > { %v862_v7 = vsel %vm569_vm3, %v1572_v6, 0.0 }
 0x2be   : > { %863 = vadd.xlane.f32.xlu0 %v862_v7 }
 0x2bf   : > { %v1574_v8 = vpop.eup %1573 }
 0x2c0   : > { %v865_v9 = vsel %vm569_vm3, %v1574_v8, 0.0 }
 0x2c1   : > { %866 = vadd.xlane.f32.xlu1 %v865_v9 }
 0x2d2   : > { %1041 = vrot.lane.b32.xlu1 %v1718_v14, %s1600_s25  ;;  %s322_s25 = scalar_lea.vmem %s1847_s8, %s1390_s30 }
 0x2d4   : > { %1126 = vrot.lane.b32.xlu0 %v1718_v14, %s1601_s26 }
 0x2e7   : > { %v858_v13 = vpop.xlane.xlu0 %857 }
 0x2e8   : > { %1575 = vrcp.f32 %v858_v13 }
 0x2f5   : > { %v1576_v15 = vpop.eup %1575 }
 0x2f6   : > { %v872_v16 = vmul.f32 %v1576_v15, %v1568_v52 }
 0x2f8   : > { %1513 = vmatmul.mubr.msk.f32.vlgmr.msra.gmra.mxu1 %vm569_vm3, %v872_v16 }
 0x2f9   : > { %1516 = vmatpush3.msra.mxu1 %v959_v1  ;;  %1519 = vmatprep.mubr.msk.f32.mxu1 %vm1594_vm1, %v1593_v2 }
 0x2fa   : > { %1517 = vmatprep.subr.mxu1 %v1593_v2 }
 0x2fb   : > { %1518 = vmatpush3.msra.mxu1 %v957_v10 }
 0x2fc   : > { %1529 = vmatprep.subr.mxu1 %v1593_v2 }
 0x341   : > { %v861_v17 = vpop.xlane.xlu1 %860 }
 0x342   : > { %1577 = vrcp.f32 %v861_v17 }
 0x347   : > { %v864_v14 = vpop.xlane.xlu0 %863 }
 0x348   : > { %1579 = vrcp.f32 %v864_v14 }
 0x34a   : > { %v867_v18 = vpop.xlane.xlu1 %866 }
 0x34b   : > { %1581 = vrcp.f32 %v867_v18  ;;  %v1127_v22 = vpop.permute.xlu0 %1126 }
 0x34e   : > { %v1042_v19 = vpop.permute.xlu1 %1041 }
 0x34f   : > { %v1578_v20 = vpop.eup %1577  ;;  %1525 = vmatpush3.msra.mxu0 %v1042_v19 }
 0x350   : > { %v873_v21 = vmul.f32 %v1578_v20, %v1570_v3  ;;  %1536 = vmatprep.subr.mxu0 %v1593_v2 }
 0x352   : > { %1520 = vmatmul.mubr.msk.f32.vlgmr.msra.gmra.mxu1 %vm569_vm3, %v873_v21 }
 0x353   : > { %1530 = vmatpush3.msra.mxu1 %v1129_v12  ;;  %1533 = vmatprep.mubr.msk.f32.mxu1 %vm1594_vm1, %v1593_v2 }
 0x354   : > { %1531 = vmatprep.subr.mxu1 %v1593_v2 }
 0x355   : > { %v1580_v23 = vpop.eup %1579  ;;  %1532 = vmatpush3.msra.mxu1 %v1127_v22 }
 0x356   : > { %v874_v24 = vmul.f32 %v1580_v23, %v1572_v6 }
 0x358   : > { %v1582_v25 = vpop.eup %1581  ;;  %1527 = vmatmul.mubr.msk.f32.vlgmr.msra.gmra.mxu0 %vm569_vm3, %v874_v24 }
 0x359   : > { %v875_v26 = vmul.f32 %v1582_v25, %v1574_v8  ;;  %1544 = vmatprep.mubr.msk.f32.mxu0 %vm1594_vm1, %v1593_v2  ;;  %1537 = vmatpush3.msra.mxu0 %v1215_v29 }
 0x35a   : > { %1538 = vmatprep.subr.mxu0 %v1593_v2 }
 0x35b   : > { %1534 = vmatmul.mubr.msk.f32.vlgmr.msra.gmra.mxu1 %vm569_vm3, %v875_v26  ;;  %1539 = vmatpush3.msra.mxu0 %v1214_v30 }
 0x35c   : > { %1540 = vmatprep.subr.mxu0 %v1593_v2 }
 0x35d   : > { %1541 = vmatpush3.msra.mxu0 %v1213_v31 }
 0x35e   : > { %1542 = vmatprep.subr.mxu0 %v1593_v2 }
 0x35f   : > { %1543 = vmatpush3.msra.mxu0 %v1212_v33 }
 0x3b8   : > { %v951_v27 = vpop.f32.mrf.mxu1 }
 0x3b9   : > { %955 = vst.msk [vmem:[#allocation3] sm:$0xff] %vm489_vm2, %v951_v27 }
 0x3ba   : > { %v1514_v28 = vpop.f32.mrf.mxu1 }
 0x412   : > { %v1031_v32 = vpop.f32.mrf.mxu1 }
 0x413   : > { %1036 = vrot.lane.b32.xlu1 %v1031_v32, %s1602_s14 }
 0x414   : > { %v1521_v34 = vpop.f32.mrf.mxu1 }
 0x418   : > { %v1116_v35 = vpop.f32.mrf.mxu0 }
 0x419   : > { %1121 = vrot.lane.b32.xlu0 %v1116_v35, %s1603_s17 }
 0x41a   : > { %v1528_v36 = vpop.f32.mrf.mxu0 }
 0x41b   : > { %v1201_v37 = vpop.f32.mrf.mxu1 }
 0x41c   : > { %1206 = vrot.lane.b32.xlu1 %v1201_v37, %s1604_s18 }
 0x41d   : > { %v1535_v38 = vpop.f32.mrf.mxu1 }
 0x485   : > { %v1037_v39 = vpop.permute.xlu1 %1036 }
 0x486   : > { %1040 = vst.msk [vmem:[#allocation3] sm:$0xff] %vm1039_vm4, %v1037_v39 }
 0x48b   : > { %v1122_v40 = vpop.permute.xlu0 %1121 }
 0x48c   : > { %1125 = vst.msk [vmem:[#allocation3] sm:$0xff] %vm1124_vm5, %v1122_v40 }
 0x48e   : > { %v1207_v41 = vpop.permute.xlu1 %1206 }
 0x48f   : > { %1210 = vst.msk [vmem:[#allocation3] sm:$0xff] %vm1209_vm6, %v1207_v41 }
 0x496   : > { %v1211_v42 = vld [vmem:[#allocation3] sm:$0xff] }
 0x497   : > { %1545 = vmatmul.mubr.msk.f32.vlgmr.msra.gmra.mxu0 %vm330_vm0, %v1211_v42 }
 0x557   : > { %v1285_v2 = vpop.f32.mrf.mxu0 }
 0x558   : > { %v1286_v43 = vadd.f32 %v1285_v2, %v1698_v11  ;;  %v1414_v11 = vld [vmem:[%s1844_s5] ss:$0 sm:$0xff] }
 0x559   : > { %v1546_v44 = vpop.f32.mrf.mxu0 }
 0x55a   : > { %v1291_v45 = vsel %vm330_vm0, %v1286_v43, 0.0 }
 0x55b   : > { %1292 = vadd.xlane.f32.xlu0 %v1291_v45 }
 0x5e4   : > { %v1293_v46 = vpop.xlane.xlu0 %1292 }
 0x5e5   : > { %v1295_v47 = vmul.f32 0.03125, %v1293_v46 }
 0x5e7   : > { %v1296_v48 = vsub.f32 %v1286_v43, %v1295_v47 }
 0x5e9   : > { %v1297_v49 = vmul.f32 %v1296_v48, %v1296_v48 }
 0x5eb   : > { %v1298_v50 = vsel %vm330_vm0, %v1297_v49, 0.0 }
 0x5ec   : > { %1299 = vadd.xlane.f32.xlu1 %v1298_v50 }
 0x675   : > { %v1300_v51 = vpop.xlane.xlu1 %1299 }
 0x676   : > { %v1301_v52 = vmul.f32 0.03125, %v1300_v51 }
 0x678   : > { %v1302_v53 = vadd.f32 1e-06, %v1301_v52 }
 0x67a   : > { %1583 = vrsqrt.f32 %v1302_v53 }
 0x687   : > { %v1584_v54 = vpop.eup %1583 }
 0x688   : > { %v1304_v55 = vmul.f32 %v1584_v54, %v1296_v48 }
 0x68a   : > { %v1311_v57 = vmul.f32 %v1414_v11, %v1304_v55 }
 0x68c   : > { %v1318_v58 = vadd.f32 %v1415_v56, %v1311_v57 }
 0x68e   : > { %1319 = vst.msk [vmem:[%s322_s25] sm:$0xff] %vm330_vm0, %v1318_v58 }
 0x68f PF: > { %s18_s27 = sadd.s32 1, %s1591_s27  }
 0x690   : > { %p15_p5 = scmp.ge.s32.totalorder %s18_s27, 4  }
 0x692   :  { %17 = sbr.rel (!%p15_p5) target bundleno = 1 (0x1), region = 85 }

</bundles_post_ra>
